<compile_context>
chip_gen: v6e
topology: v6e:2x2x1
jax: 0.10.0
libtpu: 0.0.40
codegen_flags: <defaults>
</compile_context>

<pallas_src>
import functools

import jax
import jax.numpy as jnp
from jax.experimental import pallas as pl
from jax.experimental.pallas import tpu as pltpu

_LANES = 128


def _relu_pow(z, k):
    """relu(z) ** k for a static non-negative integer k (exp-by-squaring)."""
    h = jnp.maximum(z, 0.0)
    if k == 0:
        return jnp.ones_like(z)
    if k == 1:
        return h
    if k == 2:
        return h * h
    result = h if (k & 1) else None
    base = h
    e = k >> 1
    while e:
        base = base * base
        if e & 1:
            result = base if result is None else result * base
        e >>= 1
    return result


def _mlp_kernel(w1_ref, b1_ref, w2_ref, xt_ref, ot_ref, *, k, d_in, hidden,
                n_cls, n_par=4):
    """VPU-only forward in (feature, sublane-slab, lane) layout.

    w1_ref : SMEM (hidden * d_in,)   f32  -- fc1.weight, row-major flattened
    b1_ref : SMEM (hidden,)          f32  -- fc1.bias
    w2_ref : SMEM (n_cls * hidden,)  f32  -- fc2.weight, row-major flattened
    xt_ref : VMEM (d_in, bS, 128)    f32  -- x transposed + sublane-packed
    ot_ref : VMEM (n_cls, bS, 128)   f32  -- output, lane- and sublane-dense
    """
    # One (bS, 128) slab per input feature, loaded once.
    x_rows = [xt_ref[d] for d in range(d_in)]

    # Interleaved partial accumulators break the serial fc2 add chain
    # (latency-bound) into n_par independent chains (throughput-bound).
    acc = [[None] * n_par for _ in range(n_cls)]

    for h in range(hidden):
        # fc1 row h: z = sum_d w1[h, d] * x[d] + b1[h]  (scalar-splat FMAs)
        z = x_rows[0] * w1_ref[h * d_in]
        for d in range(1, d_in):
            z = z + x_rows[d] * w1_ref[h * d_in + d]
        z = z + b1_ref[h]
        hk = _relu_pow(z, k)
        slot = h % n_par
        for c in range(n_cls):
            contrib = hk * w2_ref[c * hidden + h]
            acc[c][slot] = (contrib if acc[c][slot] is None
                            else acc[c][slot] + contrib)

    for c in range(n_cls):
        total = None
        for part in acc[c]:
            if part is None:
                continue
            total = part if total is None else total + part
        if total is None:  # hidden == 0 edge case
            total = jnp.zeros_like(x_rows[0])
        ot_ref[c] = total.astype(ot_ref.dtype)


@functools.partial(jax.jit, static_argnames=("k",))
def mlp_forward(x, w1, b1, w2, *, k=1):
    """Pallas equivalent of: fc2(relu(fc1(x)) ** k), fc2 without bias.

    x : (N, D_in)  float32
    w1: (H, D_in)  fc1.weight (PyTorch layout)
    b1: (H,)       fc1.bias
    w2: (C, H)     fc2.weight (no bias)
    returns (N, C) float32
    """
    assert isinstance(k, int) and k >= 0
    n, d_in = x.shape
    hidden, d_in2 = w1.shape
    n_cls = w2.shape[0]
    assert d_in == d_in2 and w2.shape[1] == hidden and b1.shape == (hidden,)

    # Pad the batch to a multiple of 128 lanes, then pack it as
    # (D_in, S, 128): batch on the lane axis, slabs on the sublane axis.
    n_pad = (-n) % _LANES
    xp = x.astype(jnp.float32)
    if n_pad:
        xp = jnp.pad(xp, ((0, n_pad), (0, 0)))
    n_full = n + n_pad
    s = n_full // _LANES
    xt = xp.T.reshape(d_in, s, _LANES)

    w1_flat = w1.astype(jnp.float32).reshape(-1)   # (H*D_in,) scalars -> SMEM
    w2_flat = w2.astype(jnp.float32).reshape(-1)   # (C*H,)    scalars -> SMEM
    b1_f = b1.astype(jnp.float32)                  # (H,)      scalars -> SMEM

    # Batch-parallel grid: 128-slab (16384-point) blocks for large N (a few
    # hundred KiB of VMEM, fine on every generation); collapses to a single
    # full block for small N such as the demo.
    block_s = s if s <= 128 else 128
    grid = (pl.cdiv(s, block_s),)

    kernel = functools.partial(_mlp_kernel, k=k, d_in=d_in, hidden=hidden,
                               n_cls=n_cls)
    out_t = pl.pallas_call(
        kernel,
        out_shape=jax.ShapeDtypeStruct((n_cls, s, _LANES), jnp.float32),
        grid=grid,
        in_specs=[
            pl.BlockSpec(memory_space=pltpu.MemorySpace.SMEM),   # w1 scalars
            pl.BlockSpec(memory_space=pltpu.MemorySpace.SMEM),   # b1 scalars
            pl.BlockSpec(memory_space=pltpu.MemorySpace.SMEM),   # w2 scalars
            pl.BlockSpec((d_in, block_s, _LANES), lambda i: (0, i, 0)),
        ],
        out_specs=pl.BlockSpec((n_cls, block_s, _LANES), lambda i: (0, i, 0)),
        compiler_params=pltpu.CompilerParams(
            dimension_semantics=("parallel",)),
    )(w1_flat, b1_f, w2_flat, xt)

    # (C, S, 128) -> (N, C).  For C == 1 this is pure reinterpretation
    # (reshape), no transpose pass over the output buffer.
    out_flat = out_t.reshape(n_cls, n_full)
    if n_cls == 1:
        out = out_flat.reshape(n_full, 1)
    else:
        out = out_flat.T
    return out[:n]


def mlp_reference(x, w1, b1, w2, *, k=1):
    z = x.astype(jnp.float32) @ w1.T + b1
    return jnp.maximum(z, 0.0) ** k @ w2.T


if __name__ == "__main__":
    # 3D biharmonic problem: input_size=3, hidden_size1=32, num_classes=1, k=2
    input_size, hidden_size1, num_classes, k = 3, 32, 1, 2
    N = 256  # collocation points; multiple of 128 -> fully lane/sublane-dense

    key = jax.random.PRNGKey(0)
    kx, k1, kb, k2 = jax.random.split(key, 4)

    # Deterministic parameter init (PyTorch-Linear-style uniform bounds).
    bound1 = 1.0 / (input_size ** 0.5)
    bound2 = 1.0 / (hidden_size1 ** 0.5)
    w1 = jax.random.uniform(k1, (hidden_size1, input_size), jnp.float32,
                            -bound1, bound1)
    b1 = jax.random.uniform(kb, (hidden_size1,), jnp.float32, -bound1, bound1)
    w2 = jax.random.uniform(k2, (num_classes, hidden_size1), jnp.float32,
                            -bound2, bound2)

    x = jax.random.uniform(kx, (N, input_size), jnp.float32, -1.0, 1.0)

    out = mlp_forward(x, w1, b1, w2, k=k)
    out = jax.block_until_ready(out)
    ref = mlp_reference(x, w1, b1, w2, k=k)
    assert out.shape == (N, num_classes)
    assert jnp.allclose(out, ref, atol=1e-5, rtol=1e-5), "mismatch vs reference"

    # Non-multiple-of-128 batch exercises the in-jit padding path.
    x_odd = x[:200]
    out_odd = jax.block_until_ready(mlp_forward(x_odd, w1, b1, w2, k=k))
    ref_odd = mlp_reference(x_odd, w1, b1, w2, k=k)
    assert out_odd.shape == (200, num_classes)
    assert jnp.allclose(out_odd, ref_odd, atol=1e-5, rtol=1e-5), \
        "mismatch vs reference (padded batch)"

    print("KERNEL_OK")
</pallas_src>

<mosaic_0001>
module attributes {stable_mosaic.version = 11 : i64} {
  func.func @_mlp_kernel(%arg0: i32, %arg1: memref<96xf32, #tpu.memory_space<smem>>, %arg2: memref<32xf32, #tpu.memory_space<smem>>, %arg3: memref<32xf32, #tpu.memory_space<smem>>, %arg4: memref<3x2x128xf32, #tpu.memory_space<vmem>>, %arg5: memref<1x2x128xf32, #tpu.memory_space<vmem>>) attributes {dimension_semantics = [#tpu.dimension_semantics<parallel>], iteration_bounds = array<i64: 1>, scalar_prefetch = 0 : i64, scratch_operands = 0 : i64, tpu.core_type = #tpu.core_type<tc>, window_params = [{transform_indices = @transform_0, window_bounds = array<i64: 96>}, {transform_indices = @transform_1, window_bounds = array<i64: 32>}, {transform_indices = @transform_2, window_bounds = array<i64: 32>}, {transform_indices = @transform_3, window_bounds = array<i64: 3, 2, 128>}, {transform_indices = @transform_4, window_bounds = array<i64: 1, 2, 128>}]} {
    %c0 = arith.constant 0 : index
    %c0_0 = arith.constant 0 : index
    %c0_1 = arith.constant 0 : index
    %0 = vector.load %arg4[%c0, %c0_0, %c0_1] : memref<3x2x128xf32, #tpu.memory_space<vmem>>, vector<1x2x128xf32>
    %1 = vector.shape_cast %0 : vector<1x2x128xf32> to vector<2x128xf32>
    %c1 = arith.constant 1 : index
    %c0_2 = arith.constant 0 : index
    %c0_3 = arith.constant 0 : index
    %2 = vector.load %arg4[%c1, %c0_2, %c0_3] : memref<3x2x128xf32, #tpu.memory_space<vmem>>, vector<1x2x128xf32>
    %3 = vector.shape_cast %2 : vector<1x2x128xf32> to vector<2x128xf32>
    %c2 = arith.constant 2 : index
    %c0_4 = arith.constant 0 : index
    %c0_5 = arith.constant 0 : index
    %4 = vector.load %arg4[%c2, %c0_4, %c0_5] : memref<3x2x128xf32, #tpu.memory_space<vmem>>, vector<1x2x128xf32>
    %5 = vector.shape_cast %4 : vector<1x2x128xf32> to vector<2x128xf32>
    %c0_6 = arith.constant 0 : index
    %6 = memref.load %arg1[%c0_6] : memref<96xf32, #tpu.memory_space<smem>>
    %7 = vector.broadcast %6 : f32 to vector<2x128xf32>
    %8 = arith.mulf %1, %7 : vector<2x128xf32>
    %c1_7 = arith.constant 1 : index
    %9 = memref.load %arg1[%c1_7] : memref<96xf32, #tpu.memory_space<smem>>
    %10 = vector.broadcast %9 : f32 to vector<2x128xf32>
    %11 = arith.mulf %3, %10 : vector<2x128xf32>
    %12 = arith.addf %8, %11 : vector<2x128xf32>
    %c2_8 = arith.constant 2 : index
    %13 = memref.load %arg1[%c2_8] : memref<96xf32, #tpu.memory_space<smem>>
    %14 = vector.broadcast %13 : f32 to vector<2x128xf32>
    %15 = arith.mulf %5, %14 : vector<2x128xf32>
    %16 = arith.addf %12, %15 : vector<2x128xf32>
    %c0_9 = arith.constant 0 : index
    %17 = memref.load %arg2[%c0_9] : memref<32xf32, #tpu.memory_space<smem>>
    %18 = vector.broadcast %17 : f32 to vector<2x128xf32>
    %19 = arith.addf %16, %18 : vector<2x128xf32>
    %cst = arith.constant 0.000000e+00 : f32
    %20 = vector.broadcast %cst : f32 to vector<2x128xf32>
    %21 = arith.maximumf %19, %20 : vector<2x128xf32>
    %22 = arith.mulf %21, %21 : vector<2x128xf32>
    %c0_10 = arith.constant 0 : index
    %23 = memref.load %arg3[%c0_10] : memref<32xf32, #tpu.memory_space<smem>>
    %24 = vector.broadcast %23 : f32 to vector<2x128xf32>
    %25 = arith.mulf %22, %24 : vector<2x128xf32>
    %c3 = arith.constant 3 : index
    %26 = memref.load %arg1[%c3] : memref<96xf32, #tpu.memory_space<smem>>
    %27 = vector.broadcast %26 : f32 to vector<2x128xf32>
    %28 = arith.mulf %1, %27 : vector<2x128xf32>
    %c4 = arith.constant 4 : index
    %29 = memref.load %arg1[%c4] : memref<96xf32, #tpu.memory_space<smem>>
    %30 = vector.broadcast %29 : f32 to vector<2x128xf32>
    %31 = arith.mulf %3, %30 : vector<2x128xf32>
    %32 = arith.addf %28, %31 : vector<2x128xf32>
    %c5 = arith.constant 5 : index
    %33 = memref.load %arg1[%c5] : memref<96xf32, #tpu.memory_space<smem>>
    %34 = vector.broadcast %33 : f32 to vector<2x128xf32>
    %35 = arith.mulf %5, %34 : vector<2x128xf32>
    %36 = arith.addf %32, %35 : vector<2x128xf32>
    %c1_11 = arith.constant 1 : index
    %37 = memref.load %arg2[%c1_11] : memref<32xf32, #tpu.memory_space<smem>>
    %38 = vector.broadcast %37 : f32 to vector<2x128xf32>
    %39 = arith.addf %36, %38 : vector<2x128xf32>
    %cst_12 = arith.constant 0.000000e+00 : f32
    %40 = vector.broadcast %cst_12 : f32 to vector<2x128xf32>
    %41 = arith.maximumf %39, %40 : vector<2x128xf32>
    %42 = arith.mulf %41, %41 : vector<2x128xf32>
    %c1_13 = arith.constant 1 : index
    %43 = memref.load %arg3[%c1_13] : memref<32xf32, #tpu.memory_space<smem>>
    %44 = vector.broadcast %43 : f32 to vector<2x128xf32>
    %45 = arith.mulf %42, %44 : vector<2x128xf32>
    %c6 = arith.constant 6 : index
    %46 = memref.load %arg1[%c6] : memref<96xf32, #tpu.memory_space<smem>>
    %47 = vector.broadcast %46 : f32 to vector<2x128xf32>
    %48 = arith.mulf %1, %47 : vector<2x128xf32>
    %c7 = arith.constant 7 : index
    %49 = memref.load %arg1[%c7] : memref<96xf32, #tpu.memory_space<smem>>
    %50 = vector.broadcast %49 : f32 to vector<2x128xf32>
    %51 = arith.mulf %3, %50 : vector<2x128xf32>
    %52 = arith.addf %48, %51 : vector<2x128xf32>
    %c8 = arith.constant 8 : index
    %53 = memref.load %arg1[%c8] : memref<96xf32, #tpu.memory_space<smem>>
    %54 = vector.broadcast %53 : f32 to vector<2x128xf32>
    %55 = arith.mulf %5, %54 : vector<2x128xf32>
    %56 = arith.addf %52, %55 : vector<2x128xf32>
    %c2_14 = arith.constant 2 : index
    %57 = memref.load %arg2[%c2_14] : memref<32xf32, #tpu.memory_space<smem>>
    %58 = vector.broadcast %57 : f32 to vector<2x128xf32>
    %59 = arith.addf %56, %58 : vector<2x128xf32>
    %cst_15 = arith.constant 0.000000e+00 : f32
    %60 = vector.broadcast %cst_15 : f32 to vector<2x128xf32>
    %61 = arith.maximumf %59, %60 : vector<2x128xf32>
    %62 = arith.mulf %61, %61 : vector<2x128xf32>
    %c2_16 = arith.constant 2 : index
    %63 = memref.load %arg3[%c2_16] : memref<32xf32, #tpu.memory_space<smem>>
    %64 = vector.broadcast %63 : f32 to vector<2x128xf32>
    %65 = arith.mulf %62, %64 : vector<2x128xf32>
    %c9 = arith.constant 9 : index
    %66 = memref.load %arg1[%c9] : memref<96xf32, #tpu.memory_space<smem>>
    %67 = vector.broadcast %66 : f32 to vector<2x128xf32>
    %68 = arith.mulf %1, %67 : vector<2x128xf32>
    %c10 = arith.constant 10 : index
    %69 = memref.load %arg1[%c10] : memref<96xf32, #tpu.memory_space<smem>>
    %70 = vector.broadcast %69 : f32 to vector<2x128xf32>
    %71 = arith.mulf %3, %70 : vector<2x128xf32>
    %72 = arith.addf %68, %71 : vector<2x128xf32>
    %c11 = arith.constant 11 : index
    %73 = memref.load %arg1[%c11] : memref<96xf32, #tpu.memory_space<smem>>
    %74 = vector.broadcast %73 : f32 to vector<2x128xf32>
    %75 = arith.mulf %5, %74 : vector<2x128xf32>
    %76 = arith.addf %72, %75 : vector<2x128xf32>
    %c3_17 = arith.constant 3 : index
    %77 = memref.load %arg2[%c3_17] : memref<32xf32, #tpu.memory_space<smem>>
    %78 = vector.broadcast %77 : f32 to vector<2x128xf32>
    %79 = arith.addf %76, %78 : vector<2x128xf32>
    %cst_18 = arith.constant 0.000000e+00 : f32
    %80 = vector.broadcast %cst_18 : f32 to vector<2x128xf32>
    %81 = arith.maximumf %79, %80 : vector<2x128xf32>
    %82 = arith.mulf %81, %81 : vector<2x128xf32>
    %c3_19 = arith.constant 3 : index
    %83 = memref.load %arg3[%c3_19] : memref<32xf32, #tpu.memory_space<smem>>
    %84 = vector.broadcast %83 : f32 to vector<2x128xf32>
    %85 = arith.mulf %82, %84 : vector<2x128xf32>
    %c12 = arith.constant 12 : index
    %86 = memref.load %arg1[%c12] : memref<96xf32, #tpu.memory_space<smem>>
    %87 = vector.broadcast %86 : f32 to vector<2x128xf32>
    %88 = arith.mulf %1, %87 : vector<2x128xf32>
    %c13 = arith.constant 13 : index
    %89 = memref.load %arg1[%c13] : memref<96xf32, #tpu.memory_space<smem>>
    %90 = vector.broadcast %89 : f32 to vector<2x128xf32>
    %91 = arith.mulf %3, %90 : vector<2x128xf32>
    %92 = arith.addf %88, %91 : vector<2x128xf32>
    %c14 = arith.constant 14 : index
    %93 = memref.load %arg1[%c14] : memref<96xf32, #tpu.memory_space<smem>>
    %94 = vector.broadcast %93 : f32 to vector<2x128xf32>
    %95 = arith.mulf %5, %94 : vector<2x128xf32>
    %96 = arith.addf %92, %95 : vector<2x128xf32>
    %c4_20 = arith.constant 4 : index
    %97 = memref.load %arg2[%c4_20] : memref<32xf32, #tpu.memory_space<smem>>
    %98 = vector.broadcast %97 : f32 to vector<2x128xf32>
    %99 = arith.addf %96, %98 : vector<2x128xf32>
    %cst_21 = arith.constant 0.000000e+00 : f32
    %100 = vector.broadcast %cst_21 : f32 to vector<2x128xf32>
    %101 = arith.maximumf %99, %100 : vector<2x128xf32>
    %102 = arith.mulf %101, %101 : vector<2x128xf32>
    %c4_22 = arith.constant 4 : index
    %103 = memref.load %arg3[%c4_22] : memref<32xf32, #tpu.memory_space<smem>>
    %104 = vector.broadcast %103 : f32 to vector<2x128xf32>
    %105 = arith.mulf %102, %104 : vector<2x128xf32>
    %106 = arith.addf %25, %105 : vector<2x128xf32>
    %c15 = arith.constant 15 : index
    %107 = memref.load %arg1[%c15] : memref<96xf32, #tpu.memory_space<smem>>
    %108 = vector.broadcast %107 : f32 to vector<2x128xf32>
    %109 = arith.mulf %1, %108 : vector<2x128xf32>
    %c16 = arith.constant 16 : index
    %110 = memref.load %arg1[%c16] : memref<96xf32, #tpu.memory_space<smem>>
    %111 = vector.broadcast %110 : f32 to vector<2x128xf32>
    %112 = arith.mulf %3, %111 : vector<2x128xf32>
    %113 = arith.addf %109, %112 : vector<2x128xf32>
    %c17 = arith.constant 17 : index
    %114 = memref.load %arg1[%c17] : memref<96xf32, #tpu.memory_space<smem>>
    %115 = vector.broadcast %114 : f32 to vector<2x128xf32>
    %116 = arith.mulf %5, %115 : vector<2x128xf32>
    %117 = arith.addf %113, %116 : vector<2x128xf32>
    %c5_23 = arith.constant 5 : index
    %118 = memref.load %arg2[%c5_23] : memref<32xf32, #tpu.memory_space<smem>>
    %119 = vector.broadcast %118 : f32 to vector<2x128xf32>
    %120 = arith.addf %117, %119 : vector<2x128xf32>
    %cst_24 = arith.constant 0.000000e+00 : f32
    %121 = vector.broadcast %cst_24 : f32 to vector<2x128xf32>
    %122 = arith.maximumf %120, %121 : vector<2x128xf32>
    %123 = arith.mulf %122, %122 : vector<2x128xf32>
    %c5_25 = arith.constant 5 : index
    %124 = memref.load %arg3[%c5_25] : memref<32xf32, #tpu.memory_space<smem>>
    %125 = vector.broadcast %124 : f32 to vector<2x128xf32>
    %126 = arith.mulf %123, %125 : vector<2x128xf32>
    %127 = arith.addf %45, %126 : vector<2x128xf32>
    %c18 = arith.constant 18 : index
    %128 = memref.load %arg1[%c18] : memref<96xf32, #tpu.memory_space<smem>>
    %129 = vector.broadcast %128 : f32 to vector<2x128xf32>
    %130 = arith.mulf %1, %129 : vector<2x128xf32>
    %c19 = arith.constant 19 : index
    %131 = memref.load %arg1[%c19] : memref<96xf32, #tpu.memory_space<smem>>
    %132 = vector.broadcast %131 : f32 to vector<2x128xf32>
    %133 = arith.mulf %3, %132 : vector<2x128xf32>
    %134 = arith.addf %130, %133 : vector<2x128xf32>
    %c20 = arith.constant 20 : index
    %135 = memref.load %arg1[%c20] : memref<96xf32, #tpu.memory_space<smem>>
    %136 = vector.broadcast %135 : f32 to vector<2x128xf32>
    %137 = arith.mulf %5, %136 : vector<2x128xf32>
    %138 = arith.addf %134, %137 : vector<2x128xf32>
    %c6_26 = arith.constant 6 : index
    %139 = memref.load %arg2[%c6_26] : memref<32xf32, #tpu.memory_space<smem>>
    %140 = vector.broadcast %139 : f32 to vector<2x128xf32>
    %141 = arith.addf %138, %140 : vector<2x128xf32>
    %cst_27 = arith.constant 0.000000e+00 : f32
    %142 = vector.broadcast %cst_27 : f32 to vector<2x128xf32>
    %143 = arith.maximumf %141, %142 : vector<2x128xf32>
    %144 = arith.mulf %143, %143 : vector<2x128xf32>
    %c6_28 = arith.constant 6 : index
    %145 = memref.load %arg3[%c6_28] : memref<32xf32, #tpu.memory_space<smem>>
    %146 = vector.broadcast %145 : f32 to vector<2x128xf32>
    %147 = arith.mulf %144, %146 : vector<2x128xf32>
    %148 = arith.addf %65, %147 : vector<2x128xf32>
    %c21 = arith.constant 21 : index
    %149 = memref.load %arg1[%c21] : memref<96xf32, #tpu.memory_space<smem>>
    %150 = vector.broadcast %149 : f32 to vector<2x128xf32>
    %151 = arith.mulf %1, %150 : vector<2x128xf32>
    %c22 = arith.constant 22 : index
    %152 = memref.load %arg1[%c22] : memref<96xf32, #tpu.memory_space<smem>>
    %153 = vector.broadcast %152 : f32 to vector<2x128xf32>
    %154 = arith.mulf %3, %153 : vector<2x128xf32>
    %155 = arith.addf %151, %154 : vector<2x128xf32>
    %c23 = arith.constant 23 : index
    %156 = memref.load %arg1[%c23] : memref<96xf32, #tpu.memory_space<smem>>
    %157 = vector.broadcast %156 : f32 to vector<2x128xf32>
    %158 = arith.mulf %5, %157 : vector<2x128xf32>
    %159 = arith.addf %155, %158 : vector<2x128xf32>
    %c7_29 = arith.constant 7 : index
    %160 = memref.load %arg2[%c7_29] : memref<32xf32, #tpu.memory_space<smem>>
    %161 = vector.broadcast %160 : f32 to vector<2x128xf32>
    %162 = arith.addf %159, %161 : vector<2x128xf32>
    %cst_30 = arith.constant 0.000000e+00 : f32
    %163 = vector.broadcast %cst_30 : f32 to vector<2x128xf32>
    %164 = arith.maximumf %162, %163 : vector<2x128xf32>
    %165 = arith.mulf %164, %164 : vector<2x128xf32>
    %c7_31 = arith.constant 7 : index
    %166 = memref.load %arg3[%c7_31] : memref<32xf32, #tpu.memory_space<smem>>
    %167 = vector.broadcast %166 : f32 to vector<2x128xf32>
    %168 = arith.mulf %165, %167 : vector<2x128xf32>
    %169 = arith.addf %85, %168 : vector<2x128xf32>
    %c24 = arith.constant 24 : index
    %170 = memref.load %arg1[%c24] : memref<96xf32, #tpu.memory_space<smem>>
    %171 = vector.broadcast %170 : f32 to vector<2x128xf32>
    %172 = arith.mulf %1, %171 : vector<2x128xf32>
    %c25 = arith.constant 25 : index
    %173 = memref.load %arg1[%c25] : memref<96xf32, #tpu.memory_space<smem>>
    %174 = vector.broadcast %173 : f32 to vector<2x128xf32>
    %175 = arith.mulf %3, %174 : vector<2x128xf32>
    %176 = arith.addf %172, %175 : vector<2x128xf32>
    %c26 = arith.constant 26 : index
    %177 = memref.load %arg1[%c26] : memref<96xf32, #tpu.memory_space<smem>>
    %178 = vector.broadcast %177 : f32 to vector<2x128xf32>
    %179 = arith.mulf %5, %178 : vector<2x128xf32>
    %180 = arith.addf %176, %179 : vector<2x128xf32>
    %c8_32 = arith.constant 8 : index
    %181 = memref.load %arg2[%c8_32] : memref<32xf32, #tpu.memory_space<smem>>
    %182 = vector.broadcast %181 : f32 to vector<2x128xf32>
    %183 = arith.addf %180, %182 : vector<2x128xf32>
    %cst_33 = arith.constant 0.000000e+00 : f32
    %184 = vector.broadcast %cst_33 : f32 to vector<2x128xf32>
    %185 = arith.maximumf %183, %184 : vector<2x128xf32>
    %186 = arith.mulf %185, %185 : vector<2x128xf32>
    %c8_34 = arith.constant 8 : index
    %187 = memref.load %arg3[%c8_34] : memref<32xf32, #tpu.memory_space<smem>>
    %188 = vector.broadcast %187 : f32 to vector<2x128xf32>
    %189 = arith.mulf %186, %188 : vector<2x128xf32>
    %190 = arith.addf %106, %189 : vector<2x128xf32>
    %c27 = arith.constant 27 : index
    %191 = memref.load %arg1[%c27] : memref<96xf32, #tpu.memory_space<smem>>
    %192 = vector.broadcast %191 : f32 to vector<2x128xf32>
    %193 = arith.mulf %1, %192 : vector<2x128xf32>
    %c28 = arith.constant 28 : index
    %194 = memref.load %arg1[%c28] : memref<96xf32, #tpu.memory_space<smem>>
    %195 = vector.broadcast %194 : f32 to vector<2x128xf32>
    %196 = arith.mulf %3, %195 : vector<2x128xf32>
    %197 = arith.addf %193, %196 : vector<2x128xf32>
    %c29 = arith.constant 29 : index
    %198 = memref.load %arg1[%c29] : memref<96xf32, #tpu.memory_space<smem>>
    %199 = vector.broadcast %198 : f32 to vector<2x128xf32>
    %200 = arith.mulf %5, %199 : vector<2x128xf32>
    %201 = arith.addf %197, %200 : vector<2x128xf32>
    %c9_35 = arith.constant 9 : index
    %202 = memref.load %arg2[%c9_35] : memref<32xf32, #tpu.memory_space<smem>>
    %203 = vector.broadcast %202 : f32 to vector<2x128xf32>
    %204 = arith.addf %201, %203 : vector<2x128xf32>
    %cst_36 = arith.constant 0.000000e+00 : f32
    %205 = vector.broadcast %cst_36 : f32 to vector<2x128xf32>
    %206 = arith.maximumf %204, %205 : vector<2x128xf32>
    %207 = arith.mulf %206, %206 : vector<2x128xf32>
    %c9_37 = arith.constant 9 : index
    %208 = memref.load %arg3[%c9_37] : memref<32xf32, #tpu.memory_space<smem>>
    %209 = vector.broadcast %208 : f32 to vector<2x128xf32>
    %210 = arith.mulf %207, %209 : vector<2x128xf32>
    %211 = arith.addf %127, %210 : vector<2x128xf32>
    %c30 = arith.constant 30 : index
    %212 = memref.load %arg1[%c30] : memref<96xf32, #tpu.memory_space<smem>>
    %213 = vector.broadcast %212 : f32 to vector<2x128xf32>
    %214 = arith.mulf %1, %213 : vector<2x128xf32>
    %c31 = arith.constant 31 : index
    %215 = memref.load %arg1[%c31] : memref<96xf32, #tpu.memory_space<smem>>
    %216 = vector.broadcast %215 : f32 to vector<2x128xf32>
    %217 = arith.mulf %3, %216 : vector<2x128xf32>
    %218 = arith.addf %214, %217 : vector<2x128xf32>
    %c32 = arith.constant 32 : index
    %219 = memref.load %arg1[%c32] : memref<96xf32, #tpu.memory_space<smem>>
    %220 = vector.broadcast %219 : f32 to vector<2x128xf32>
    %221 = arith.mulf %5, %220 : vector<2x128xf32>
    %222 = arith.addf %218, %221 : vector<2x128xf32>
    %c10_38 = arith.constant 10 : index
    %223 = memref.load %arg2[%c10_38] : memref<32xf32, #tpu.memory_space<smem>>
    %224 = vector.broadcast %223 : f32 to vector<2x128xf32>
    %225 = arith.addf %222, %224 : vector<2x128xf32>
    %cst_39 = arith.constant 0.000000e+00 : f32
    %226 = vector.broadcast %cst_39 : f32 to vector<2x128xf32>
    %227 = arith.maximumf %225, %226 : vector<2x128xf32>
    %228 = arith.mulf %227, %227 : vector<2x128xf32>
    %c10_40 = arith.constant 10 : index
    %229 = memref.load %arg3[%c10_40] : memref<32xf32, #tpu.memory_space<smem>>
    %230 = vector.broadcast %229 : f32 to vector<2x128xf32>
    %231 = arith.mulf %228, %230 : vector<2x128xf32>
    %232 = arith.addf %148, %231 : vector<2x128xf32>
    %c33 = arith.constant 33 : index
    %233 = memref.load %arg1[%c33] : memref<96xf32, #tpu.memory_space<smem>>
    %234 = vector.broadcast %233 : f32 to vector<2x128xf32>
    %235 = arith.mulf %1, %234 : vector<2x128xf32>
    %c34 = arith.constant 34 : index
    %236 = memref.load %arg1[%c34] : memref<96xf32, #tpu.memory_space<smem>>
    %237 = vector.broadcast %236 : f32 to vector<2x128xf32>
    %238 = arith.mulf %3, %237 : vector<2x128xf32>
    %239 = arith.addf %235, %238 : vector<2x128xf32>
    %c35 = arith.constant 35 : index
    %240 = memref.load %arg1[%c35] : memref<96xf32, #tpu.memory_space<smem>>
    %241 = vector.broadcast %240 : f32 to vector<2x128xf32>
    %242 = arith.mulf %5, %241 : vector<2x128xf32>
    %243 = arith.addf %239, %242 : vector<2x128xf32>
    %c11_41 = arith.constant 11 : index
    %244 = memref.load %arg2[%c11_41] : memref<32xf32, #tpu.memory_space<smem>>
    %245 = vector.broadcast %244 : f32 to vector<2x128xf32>
    %246 = arith.addf %243, %245 : vector<2x128xf32>
    %cst_42 = arith.constant 0.000000e+00 : f32
    %247 = vector.broadcast %cst_42 : f32 to vector<2x128xf32>
    %248 = arith.maximumf %246, %247 : vector<2x128xf32>
    %249 = arith.mulf %248, %248 : vector<2x128xf32>
    %c11_43 = arith.constant 11 : index
    %250 = memref.load %arg3[%c11_43] : memref<32xf32, #tpu.memory_space<smem>>
    %251 = vector.broadcast %250 : f32 to vector<2x128xf32>
    %252 = arith.mulf %249, %251 : vector<2x128xf32>
    %253 = arith.addf %169, %252 : vector<2x128xf32>
    %c36 = arith.constant 36 : index
    %254 = memref.load %arg1[%c36] : memref<96xf32, #tpu.memory_space<smem>>
    %255 = vector.broadcast %254 : f32 to vector<2x128xf32>
    %256 = arith.mulf %1, %255 : vector<2x128xf32>
    %c37 = arith.constant 37 : index
    %257 = memref.load %arg1[%c37] : memref<96xf32, #tpu.memory_space<smem>>
    %258 = vector.broadcast %257 : f32 to vector<2x128xf32>
    %259 = arith.mulf %3, %258 : vector<2x128xf32>
    %260 = arith.addf %256, %259 : vector<2x128xf32>
    %c38 = arith.constant 38 : index
    %261 = memref.load %arg1[%c38] : memref<96xf32, #tpu.memory_space<smem>>
    %262 = vector.broadcast %261 : f32 to vector<2x128xf32>
    %263 = arith.mulf %5, %262 : vector<2x128xf32>
    %264 = arith.addf %260, %263 : vector<2x128xf32>
    %c12_44 = arith.constant 12 : index
    %265 = memref.load %arg2[%c12_44] : memref<32xf32, #tpu.memory_space<smem>>
    %266 = vector.broadcast %265 : f32 to vector<2x128xf32>
    %267 = arith.addf %264, %266 : vector<2x128xf32>
    %cst_45 = arith.constant 0.000000e+00 : f32
    %268 = vector.broadcast %cst_45 : f32 to vector<2x128xf32>
    %269 = arith.maximumf %267, %268 : vector<2x128xf32>
    %270 = arith.mulf %269, %269 : vector<2x128xf32>
    %c12_46 = arith.constant 12 : index
    %271 = memref.load %arg3[%c12_46] : memref<32xf32, #tpu.memory_space<smem>>
    %272 = vector.broadcast %271 : f32 to vector<2x128xf32>
    %273 = arith.mulf %270, %272 : vector<2x128xf32>
    %274 = arith.addf %190, %273 : vector<2x128xf32>
    %c39 = arith.constant 39 : index
    %275 = memref.load %arg1[%c39] : memref<96xf32, #tpu.memory_space<smem>>
    %276 = vector.broadcast %275 : f32 to vector<2x128xf32>
    %277 = arith.mulf %1, %276 : vector<2x128xf32>
    %c40 = arith.constant 40 : index
    %278 = memref.load %arg1[%c40] : memref<96xf32, #tpu.memory_space<smem>>
    %279 = vector.broadcast %278 : f32 to vector<2x128xf32>
    %280 = arith.mulf %3, %279 : vector<2x128xf32>
    %281 = arith.addf %277, %280 : vector<2x128xf32>
    %c41 = arith.constant 41 : index
    %282 = memref.load %arg1[%c41] : memref<96xf32, #tpu.memory_space<smem>>
    %283 = vector.broadcast %282 : f32 to vector<2x128xf32>
    %284 = arith.mulf %5, %283 : vector<2x128xf32>
    %285 = arith.addf %281, %284 : vector<2x128xf32>
    %c13_47 = arith.constant 13 : index
    %286 = memref.load %arg2[%c13_47] : memref<32xf32, #tpu.memory_space<smem>>
    %287 = vector.broadcast %286 : f32 to vector<2x128xf32>
    %288 = arith.addf %285, %287 : vector<2x128xf32>
    %cst_48 = arith.constant 0.000000e+00 : f32
    %289 = vector.broadcast %cst_48 : f32 to vector<2x128xf32>
    %290 = arith.maximumf %288, %289 : vector<2x128xf32>
    %291 = arith.mulf %290, %290 : vector<2x128xf32>
    %c13_49 = arith.constant 13 : index
    %292 = memref.load %arg3[%c13_49] : memref<32xf32, #tpu.memory_space<smem>>
    %293 = vector.broadcast %292 : f32 to vector<2x128xf32>
    %294 = arith.mulf %291, %293 : vector<2x128xf32>
    %295 = arith.addf %211, %294 : vector<2x128xf32>
    %c42 = arith.constant 42 : index
    %296 = memref.load %arg1[%c42] : memref<96xf32, #tpu.memory_space<smem>>
    %297 = vector.broadcast %296 : f32 to vector<2x128xf32>
    %298 = arith.mulf %1, %297 : vector<2x128xf32>
    %c43 = arith.constant 43 : index
    %299 = memref.load %arg1[%c43] : memref<96xf32, #tpu.memory_space<smem>>
    %300 = vector.broadcast %299 : f32 to vector<2x128xf32>
    %301 = arith.mulf %3, %300 : vector<2x128xf32>
    %302 = arith.addf %298, %301 : vector<2x128xf32>
    %c44 = arith.constant 44 : index
    %303 = memref.load %arg1[%c44] : memref<96xf32, #tpu.memory_space<smem>>
    %304 = vector.broadcast %303 : f32 to vector<2x128xf32>
    %305 = arith.mulf %5, %304 : vector<2x128xf32>
    %306 = arith.addf %302, %305 : vector<2x128xf32>
    %c14_50 = arith.constant 14 : index
    %307 = memref.load %arg2[%c14_50] : memref<32xf32, #tpu.memory_space<smem>>
    %308 = vector.broadcast %307 : f32 to vector<2x128xf32>
    %309 = arith.addf %306, %308 : vector<2x128xf32>
    %cst_51 = arith.constant 0.000000e+00 : f32
    %310 = vector.broadcast %cst_51 : f32 to vector<2x128xf32>
    %311 = arith.maximumf %309, %310 : vector<2x128xf32>
    %312 = arith.mulf %311, %311 : vector<2x128xf32>
    %c14_52 = arith.constant 14 : index
    %313 = memref.load %arg3[%c14_52] : memref<32xf32, #tpu.memory_space<smem>>
    %314 = vector.broadcast %313 : f32 to vector<2x128xf32>
    %315 = arith.mulf %312, %314 : vector<2x128xf32>
    %316 = arith.addf %232, %315 : vector<2x128xf32>
    %c45 = arith.constant 45 : index
    %317 = memref.load %arg1[%c45] : memref<96xf32, #tpu.memory_space<smem>>
    %318 = vector.broadcast %317 : f32 to vector<2x128xf32>
    %319 = arith.mulf %1, %318 : vector<2x128xf32>
    %c46 = arith.constant 46 : index
    %320 = memref.load %arg1[%c46] : memref<96xf32, #tpu.memory_space<smem>>
    %321 = vector.broadcast %320 : f32 to vector<2x128xf32>
    %322 = arith.mulf %3, %321 : vector<2x128xf32>
    %323 = arith.addf %319, %322 : vector<2x128xf32>
    %c47 = arith.constant 47 : index
    %324 = memref.load %arg1[%c47] : memref<96xf32, #tpu.memory_space<smem>>
    %325 = vector.broadcast %324 : f32 to vector<2x128xf32>
    %326 = arith.mulf %5, %325 : vector<2x128xf32>
    %327 = arith.addf %323, %326 : vector<2x128xf32>
    %c15_53 = arith.constant 15 : index
    %328 = memref.load %arg2[%c15_53] : memref<32xf32, #tpu.memory_space<smem>>
    %329 = vector.broadcast %328 : f32 to vector<2x128xf32>
    %330 = arith.addf %327, %329 : vector<2x128xf32>
    %cst_54 = arith.constant 0.000000e+00 : f32
    %331 = vector.broadcast %cst_54 : f32 to vector<2x128xf32>
    %332 = arith.maximumf %330, %331 : vector<2x128xf32>
    %333 = arith.mulf %332, %332 : vector<2x128xf32>
    %c15_55 = arith.constant 15 : index
    %334 = memref.load %arg3[%c15_55] : memref<32xf32, #tpu.memory_space<smem>>
    %335 = vector.broadcast %334 : f32 to vector<2x128xf32>
    %336 = arith.mulf %333, %335 : vector<2x128xf32>
    %337 = arith.addf %253, %336 : vector<2x128xf32>
    %c48 = arith.constant 48 : index
    %338 = memref.load %arg1[%c48] : memref<96xf32, #tpu.memory_space<smem>>
    %339 = vector.broadcast %338 : f32 to vector<2x128xf32>
    %340 = arith.mulf %1, %339 : vector<2x128xf32>
    %c49 = arith.constant 49 : index
    %341 = memref.load %arg1[%c49] : memref<96xf32, #tpu.memory_space<smem>>
    %342 = vector.broadcast %341 : f32 to vector<2x128xf32>
    %343 = arith.mulf %3, %342 : vector<2x128xf32>
    %344 = arith.addf %340, %343 : vector<2x128xf32>
    %c50 = arith.constant 50 : index
    %345 = memref.load %arg1[%c50] : memref<96xf32, #tpu.memory_space<smem>>
    %346 = vector.broadcast %345 : f32 to vector<2x128xf32>
    %347 = arith.mulf %5, %346 : vector<2x128xf32>
    %348 = arith.addf %344, %347 : vector<2x128xf32>
    %c16_56 = arith.constant 16 : index
    %349 = memref.load %arg2[%c16_56] : memref<32xf32, #tpu.memory_space<smem>>
    %350 = vector.broadcast %349 : f32 to vector<2x128xf32>
    %351 = arith.addf %348, %350 : vector<2x128xf32>
    %cst_57 = arith.constant 0.000000e+00 : f32
    %352 = vector.broadcast %cst_57 : f32 to vector<2x128xf32>
    %353 = arith.maximumf %351, %352 : vector<2x128xf32>
    %354 = arith.mulf %353, %353 : vector<2x128xf32>
    %c16_58 = arith.constant 16 : index
    %355 = memref.load %arg3[%c16_58] : memref<32xf32, #tpu.memory_space<smem>>
    %356 = vector.broadcast %355 : f32 to vector<2x128xf32>
    %357 = arith.mulf %354, %356 : vector<2x128xf32>
    %358 = arith.addf %274, %357 : vector<2x128xf32>
    %c51 = arith.constant 51 : index
    %359 = memref.load %arg1[%c51] : memref<96xf32, #tpu.memory_space<smem>>
    %360 = vector.broadcast %359 : f32 to vector<2x128xf32>
    %361 = arith.mulf %1, %360 : vector<2x128xf32>
    %c52 = arith.constant 52 : index
    %362 = memref.load %arg1[%c52] : memref<96xf32, #tpu.memory_space<smem>>
    %363 = vector.broadcast %362 : f32 to vector<2x128xf32>
    %364 = arith.mulf %3, %363 : vector<2x128xf32>
    %365 = arith.addf %361, %364 : vector<2x128xf32>
    %c53 = arith.constant 53 : index
    %366 = memref.load %arg1[%c53] : memref<96xf32, #tpu.memory_space<smem>>
    %367 = vector.broadcast %366 : f32 to vector<2x128xf32>
    %368 = arith.mulf %5, %367 : vector<2x128xf32>
    %369 = arith.addf %365, %368 : vector<2x128xf32>
    %c17_59 = arith.constant 17 : index
    %370 = memref.load %arg2[%c17_59] : memref<32xf32, #tpu.memory_space<smem>>
    %371 = vector.broadcast %370 : f32 to vector<2x128xf32>
    %372 = arith.addf %369, %371 : vector<2x128xf32>
    %cst_60 = arith.constant 0.000000e+00 : f32
    %373 = vector.broadcast %cst_60 : f32 to vector<2x128xf32>
    %374 = arith.maximumf %372, %373 : vector<2x128xf32>
    %375 = arith.mulf %374, %374 : vector<2x128xf32>
    %c17_61 = arith.constant 17 : index
    %376 = memref.load %arg3[%c17_61] : memref<32xf32, #tpu.memory_space<smem>>
    %377 = vector.broadcast %376 : f32 to vector<2x128xf32>
    %378 = arith.mulf %375, %377 : vector<2x128xf32>
    %379 = arith.addf %295, %378 : vector<2x128xf32>
    %c54 = arith.constant 54 : index
    %380 = memref.load %arg1[%c54] : memref<96xf32, #tpu.memory_space<smem>>
    %381 = vector.broadcast %380 : f32 to vector<2x128xf32>
    %382 = arith.mulf %1, %381 : vector<2x128xf32>
    %c55 = arith.constant 55 : index
    %383 = memref.load %arg1[%c55] : memref<96xf32, #tpu.memory_space<smem>>
    %384 = vector.broadcast %383 : f32 to vector<2x128xf32>
    %385 = arith.mulf %3, %384 : vector<2x128xf32>
    %386 = arith.addf %382, %385 : vector<2x128xf32>
    %c56 = arith.constant 56 : index
    %387 = memref.load %arg1[%c56] : memref<96xf32, #tpu.memory_space<smem>>
    %388 = vector.broadcast %387 : f32 to vector<2x128xf32>
    %389 = arith.mulf %5, %388 : vector<2x128xf32>
    %390 = arith.addf %386, %389 : vector<2x128xf32>
    %c18_62 = arith.constant 18 : index
    %391 = memref.load %arg2[%c18_62] : memref<32xf32, #tpu.memory_space<smem>>
    %392 = vector.broadcast %391 : f32 to vector<2x128xf32>
    %393 = arith.addf %390, %392 : vector<2x128xf32>
    %cst_63 = arith.constant 0.000000e+00 : f32
    %394 = vector.broadcast %cst_63 : f32 to vector<2x128xf32>
    %395 = arith.maximumf %393, %394 : vector<2x128xf32>
    %396 = arith.mulf %395, %395 : vector<2x128xf32>
    %c18_64 = arith.constant 18 : index
    %397 = memref.load %arg3[%c18_64] : memref<32xf32, #tpu.memory_space<smem>>
    %398 = vector.broadcast %397 : f32 to vector<2x128xf32>
    %399 = arith.mulf %396, %398 : vector<2x128xf32>
    %400 = arith.addf %316, %399 : vector<2x128xf32>
    %c57 = arith.constant 57 : index
    %401 = memref.load %arg1[%c57] : memref<96xf32, #tpu.memory_space<smem>>
    %402 = vector.broadcast %401 : f32 to vector<2x128xf32>
    %403 = arith.mulf %1, %402 : vector<2x128xf32>
    %c58 = arith.constant 58 : index
    %404 = memref.load %arg1[%c58] : memref<96xf32, #tpu.memory_space<smem>>
    %405 = vector.broadcast %404 : f32 to vector<2x128xf32>
    %406 = arith.mulf %3, %405 : vector<2x128xf32>
    %407 = arith.addf %403, %406 : vector<2x128xf32>
    %c59 = arith.constant 59 : index
    %408 = memref.load %arg1[%c59] : memref<96xf32, #tpu.memory_space<smem>>
    %409 = vector.broadcast %408 : f32 to vector<2x128xf32>
    %410 = arith.mulf %5, %409 : vector<2x128xf32>
    %411 = arith.addf %407, %410 : vector<2x128xf32>
    %c19_65 = arith.constant 19 : index
    %412 = memref.load %arg2[%c19_65] : memref<32xf32, #tpu.memory_space<smem>>
    %413 = vector.broadcast %412 : f32 to vector<2x128xf32>
    %414 = arith.addf %411, %413 : vector<2x128xf32>
    %cst_66 = arith.constant 0.000000e+00 : f32
    %415 = vector.broadcast %cst_66 : f32 to vector<2x128xf32>
    %416 = arith.maximumf %414, %415 : vector<2x128xf32>
    %417 = arith.mulf %416, %416 : vector<2x128xf32>
    %c19_67 = arith.constant 19 : index
    %418 = memref.load %arg3[%c19_67] : memref<32xf32, #tpu.memory_space<smem>>
    %419 = vector.broadcast %418 : f32 to vector<2x128xf32>
    %420 = arith.mulf %417, %419 : vector<2x128xf32>
    %421 = arith.addf %337, %420 : vector<2x128xf32>
    %c60 = arith.constant 60 : index
    %422 = memref.load %arg1[%c60] : memref<96xf32, #tpu.memory_space<smem>>
    %423 = vector.broadcast %422 : f32 to vector<2x128xf32>
    %424 = arith.mulf %1, %423 : vector<2x128xf32>
    %c61 = arith.constant 61 : index
    %425 = memref.load %arg1[%c61] : memref<96xf32, #tpu.memory_space<smem>>
    %426 = vector.broadcast %425 : f32 to vector<2x128xf32>
    %427 = arith.mulf %3, %426 : vector<2x128xf32>
    %428 = arith.addf %424, %427 : vector<2x128xf32>
    %c62 = arith.constant 62 : index
    %429 = memref.load %arg1[%c62] : memref<96xf32, #tpu.memory_space<smem>>
    %430 = vector.broadcast %429 : f32 to vector<2x128xf32>
    %431 = arith.mulf %5, %430 : vector<2x128xf32>
    %432 = arith.addf %428, %431 : vector<2x128xf32>
    %c20_68 = arith.constant 20 : index
    %433 = memref.load %arg2[%c20_68] : memref<32xf32, #tpu.memory_space<smem>>
    %434 = vector.broadcast %433 : f32 to vector<2x128xf32>
    %435 = arith.addf %432, %434 : vector<2x128xf32>
    %cst_69 = arith.constant 0.000000e+00 : f32
    %436 = vector.broadcast %cst_69 : f32 to vector<2x128xf32>
    %437 = arith.maximumf %435, %436 : vector<2x128xf32>
    %438 = arith.mulf %437, %437 : vector<2x128xf32>
    %c20_70 = arith.constant 20 : index
    %439 = memref.load %arg3[%c20_70] : memref<32xf32, #tpu.memory_space<smem>>
    %440 = vector.broadcast %439 : f32 to vector<2x128xf32>
    %441 = arith.mulf %438, %440 : vector<2x128xf32>
    %442 = arith.addf %358, %441 : vector<2x128xf32>
    %c63 = arith.constant 63 : index
    %443 = memref.load %arg1[%c63] : memref<96xf32, #tpu.memory_space<smem>>
    %444 = vector.broadcast %443 : f32 to vector<2x128xf32>
    %445 = arith.mulf %1, %444 : vector<2x128xf32>
    %c64 = arith.constant 64 : index
    %446 = memref.load %arg1[%c64] : memref<96xf32, #tpu.memory_space<smem>>
    %447 = vector.broadcast %446 : f32 to vector<2x128xf32>
    %448 = arith.mulf %3, %447 : vector<2x128xf32>
    %449 = arith.addf %445, %448 : vector<2x128xf32>
    %c65 = arith.constant 65 : index
    %450 = memref.load %arg1[%c65] : memref<96xf32, #tpu.memory_space<smem>>
    %451 = vector.broadcast %450 : f32 to vector<2x128xf32>
    %452 = arith.mulf %5, %451 : vector<2x128xf32>
    %453 = arith.addf %449, %452 : vector<2x128xf32>
    %c21_71 = arith.constant 21 : index
    %454 = memref.load %arg2[%c21_71] : memref<32xf32, #tpu.memory_space<smem>>
    %455 = vector.broadcast %454 : f32 to vector<2x128xf32>
    %456 = arith.addf %453, %455 : vector<2x128xf32>
    %cst_72 = arith.constant 0.000000e+00 : f32
    %457 = vector.broadcast %cst_72 : f32 to vector<2x128xf32>
    %458 = arith.maximumf %456, %457 : vector<2x128xf32>
    %459 = arith.mulf %458, %458 : vector<2x128xf32>
    %c21_73 = arith.constant 21 : index
    %460 = memref.load %arg3[%c21_73] : memref<32xf32, #tpu.memory_space<smem>>
    %461 = vector.broadcast %460 : f32 to vector<2x128xf32>
    %462 = arith.mulf %459, %461 : vector<2x128xf32>
    %463 = arith.addf %379, %462 : vector<2x128xf32>
    %c66 = arith.constant 66 : index
    %464 = memref.load %arg1[%c66] : memref<96xf32, #tpu.memory_space<smem>>
    %465 = vector.broadcast %464 : f32 to vector<2x128xf32>
    %466 = arith.mulf %1, %465 : vector<2x128xf32>
    %c67 = arith.constant 67 : index
    %467 = memref.load %arg1[%c67] : memref<96xf32, #tpu.memory_space<smem>>
    %468 = vector.broadcast %467 : f32 to vector<2x128xf32>
    %469 = arith.mulf %3, %468 : vector<2x128xf32>
    %470 = arith.addf %466, %469 : vector<2x128xf32>
    %c68 = arith.constant 68 : index
    %471 = memref.load %arg1[%c68] : memref<96xf32, #tpu.memory_space<smem>>
    %472 = vector.broadcast %471 : f32 to vector<2x128xf32>
    %473 = arith.mulf %5, %472 : vector<2x128xf32>
    %474 = arith.addf %470, %473 : vector<2x128xf32>
    %c22_74 = arith.constant 22 : index
    %475 = memref.load %arg2[%c22_74] : memref<32xf32, #tpu.memory_space<smem>>
    %476 = vector.broadcast %475 : f32 to vector<2x128xf32>
    %477 = arith.addf %474, %476 : vector<2x128xf32>
    %cst_75 = arith.constant 0.000000e+00 : f32
    %478 = vector.broadcast %cst_75 : f32 to vector<2x128xf32>
    %479 = arith.maximumf %477, %478 : vector<2x128xf32>
    %480 = arith.mulf %479, %479 : vector<2x128xf32>
    %c22_76 = arith.constant 22 : index
    %481 = memref.load %arg3[%c22_76] : memref<32xf32, #tpu.memory_space<smem>>
    %482 = vector.broadcast %481 : f32 to vector<2x128xf32>
    %483 = arith.mulf %480, %482 : vector<2x128xf32>
    %484 = arith.addf %400, %483 : vector<2x128xf32>
    %c69 = arith.constant 69 : index
    %485 = memref.load %arg1[%c69] : memref<96xf32, #tpu.memory_space<smem>>
    %486 = vector.broadcast %485 : f32 to vector<2x128xf32>
    %487 = arith.mulf %1, %486 : vector<2x128xf32>
    %c70 = arith.constant 70 : index
    %488 = memref.load %arg1[%c70] : memref<96xf32, #tpu.memory_space<smem>>
    %489 = vector.broadcast %488 : f32 to vector<2x128xf32>
    %490 = arith.mulf %3, %489 : vector<2x128xf32>
    %491 = arith.addf %487, %490 : vector<2x128xf32>
    %c71 = arith.constant 71 : index
    %492 = memref.load %arg1[%c71] : memref<96xf32, #tpu.memory_space<smem>>
    %493 = vector.broadcast %492 : f32 to vector<2x128xf32>
    %494 = arith.mulf %5, %493 : vector<2x128xf32>
    %495 = arith.addf %491, %494 : vector<2x128xf32>
    %c23_77 = arith.constant 23 : index
    %496 = memref.load %arg2[%c23_77] : memref<32xf32, #tpu.memory_space<smem>>
    %497 = vector.broadcast %496 : f32 to vector<2x128xf32>
    %498 = arith.addf %495, %497 : vector<2x128xf32>
    %cst_78 = arith.constant 0.000000e+00 : f32
    %499 = vector.broadcast %cst_78 : f32 to vector<2x128xf32>
    %500 = arith.maximumf %498, %499 : vector<2x128xf32>
    %501 = arith.mulf %500, %500 : vector<2x128xf32>
    %c23_79 = arith.constant 23 : index
    %502 = memref.load %arg3[%c23_79] : memref<32xf32, #tpu.memory_space<smem>>
    %503 = vector.broadcast %502 : f32 to vector<2x128xf32>
    %504 = arith.mulf %501, %503 : vector<2x128xf32>
    %505 = arith.addf %421, %504 : vector<2x128xf32>
    %c72 = arith.constant 72 : index
    %506 = memref.load %arg1[%c72] : memref<96xf32, #tpu.memory_space<smem>>
    %507 = vector.broadcast %506 : f32 to vector<2x128xf32>
    %508 = arith.mulf %1, %507 : vector<2x128xf32>
    %c73 = arith.constant 73 : index
    %509 = memref.load %arg1[%c73] : memref<96xf32, #tpu.memory_space<smem>>
    %510 = vector.broadcast %509 : f32 to vector<2x128xf32>
    %511 = arith.mulf %3, %510 : vector<2x128xf32>
    %512 = arith.addf %508, %511 : vector<2x128xf32>
    %c74 = arith.constant 74 : index
    %513 = memref.load %arg1[%c74] : memref<96xf32, #tpu.memory_space<smem>>
    %514 = vector.broadcast %513 : f32 to vector<2x128xf32>
    %515 = arith.mulf %5, %514 : vector<2x128xf32>
    %516 = arith.addf %512, %515 : vector<2x128xf32>
    %c24_80 = arith.constant 24 : index
    %517 = memref.load %arg2[%c24_80] : memref<32xf32, #tpu.memory_space<smem>>
    %518 = vector.broadcast %517 : f32 to vector<2x128xf32>
    %519 = arith.addf %516, %518 : vector<2x128xf32>
    %cst_81 = arith.constant 0.000000e+00 : f32
    %520 = vector.broadcast %cst_81 : f32 to vector<2x128xf32>
    %521 = arith.maximumf %519, %520 : vector<2x128xf32>
    %522 = arith.mulf %521, %521 : vector<2x128xf32>
    %c24_82 = arith.constant 24 : index
    %523 = memref.load %arg3[%c24_82] : memref<32xf32, #tpu.memory_space<smem>>
    %524 = vector.broadcast %523 : f32 to vector<2x128xf32>
    %525 = arith.mulf %522, %524 : vector<2x128xf32>
    %526 = arith.addf %442, %525 : vector<2x128xf32>
    %c75 = arith.constant 75 : index
    %527 = memref.load %arg1[%c75] : memref<96xf32, #tpu.memory_space<smem>>
    %528 = vector.broadcast %527 : f32 to vector<2x128xf32>
    %529 = arith.mulf %1, %528 : vector<2x128xf32>
    %c76 = arith.constant 76 : index
    %530 = memref.load %arg1[%c76] : memref<96xf32, #tpu.memory_space<smem>>
    %531 = vector.broadcast %530 : f32 to vector<2x128xf32>
    %532 = arith.mulf %3, %531 : vector<2x128xf32>
    %533 = arith.addf %529, %532 : vector<2x128xf32>
    %c77 = arith.constant 77 : index
    %534 = memref.load %arg1[%c77] : memref<96xf32, #tpu.memory_space<smem>>
    %535 = vector.broadcast %534 : f32 to vector<2x128xf32>
    %536 = arith.mulf %5, %535 : vector<2x128xf32>
    %537 = arith.addf %533, %536 : vector<2x128xf32>
    %c25_83 = arith.constant 25 : index
    %538 = memref.load %arg2[%c25_83] : memref<32xf32, #tpu.memory_space<smem>>
    %539 = vector.broadcast %538 : f32 to vector<2x128xf32>
    %540 = arith.addf %537, %539 : vector<2x128xf32>
    %cst_84 = arith.constant 0.000000e+00 : f32
    %541 = vector.broadcast %cst_84 : f32 to vector<2x128xf32>
    %542 = arith.maximumf %540, %541 : vector<2x128xf32>
    %543 = arith.mulf %542, %542 : vector<2x128xf32>
    %c25_85 = arith.constant 25 : index
    %544 = memref.load %arg3[%c25_85] : memref<32xf32, #tpu.memory_space<smem>>
    %545 = vector.broadcast %544 : f32 to vector<2x128xf32>
    %546 = arith.mulf %543, %545 : vector<2x128xf32>
    %547 = arith.addf %463, %546 : vector<2x128xf32>
    %c78 = arith.constant 78 : index
    %548 = memref.load %arg1[%c78] : memref<96xf32, #tpu.memory_space<smem>>
    %549 = vector.broadcast %548 : f32 to vector<2x128xf32>
    %550 = arith.mulf %1, %549 : vector<2x128xf32>
    %c79 = arith.constant 79 : index
    %551 = memref.load %arg1[%c79] : memref<96xf32, #tpu.memory_space<smem>>
    %552 = vector.broadcast %551 : f32 to vector<2x128xf32>
    %553 = arith.mulf %3, %552 : vector<2x128xf32>
    %554 = arith.addf %550, %553 : vector<2x128xf32>
    %c80 = arith.constant 80 : index
    %555 = memref.load %arg1[%c80] : memref<96xf32, #tpu.memory_space<smem>>
    %556 = vector.broadcast %555 : f32 to vector<2x128xf32>
    %557 = arith.mulf %5, %556 : vector<2x128xf32>
    %558 = arith.addf %554, %557 : vector<2x128xf32>
    %c26_86 = arith.constant 26 : index
    %559 = memref.load %arg2[%c26_86] : memref<32xf32, #tpu.memory_space<smem>>
    %560 = vector.broadcast %559 : f32 to vector<2x128xf32>
    %561 = arith.addf %558, %560 : vector<2x128xf32>
    %cst_87 = arith.constant 0.000000e+00 : f32
    %562 = vector.broadcast %cst_87 : f32 to vector<2x128xf32>
    %563 = arith.maximumf %561, %562 : vector<2x128xf32>
    %564 = arith.mulf %563, %563 : vector<2x128xf32>
    %c26_88 = arith.constant 26 : index
    %565 = memref.load %arg3[%c26_88] : memref<32xf32, #tpu.memory_space<smem>>
    %566 = vector.broadcast %565 : f32 to vector<2x128xf32>
    %567 = arith.mulf %564, %566 : vector<2x128xf32>
    %568 = arith.addf %484, %567 : vector<2x128xf32>
    %c81 = arith.constant 81 : index
    %569 = memref.load %arg1[%c81] : memref<96xf32, #tpu.memory_space<smem>>
    %570 = vector.broadcast %569 : f32 to vector<2x128xf32>
    %571 = arith.mulf %1, %570 : vector<2x128xf32>
    %c82 = arith.constant 82 : index
    %572 = memref.load %arg1[%c82] : memref<96xf32, #tpu.memory_space<smem>>
    %573 = vector.broadcast %572 : f32 to vector<2x128xf32>
    %574 = arith.mulf %3, %573 : vector<2x128xf32>
    %575 = arith.addf %571, %574 : vector<2x128xf32>
    %c83 = arith.constant 83 : index
    %576 = memref.load %arg1[%c83] : memref<96xf32, #tpu.memory_space<smem>>
    %577 = vector.broadcast %576 : f32 to vector<2x128xf32>
    %578 = arith.mulf %5, %577 : vector<2x128xf32>
    %579 = arith.addf %575, %578 : vector<2x128xf32>
    %c27_89 = arith.constant 27 : index
    %580 = memref.load %arg2[%c27_89] : memref<32xf32, #tpu.memory_space<smem>>
    %581 = vector.broadcast %580 : f32 to vector<2x128xf32>
    %582 = arith.addf %579, %581 : vector<2x128xf32>
    %cst_90 = arith.constant 0.000000e+00 : f32
    %583 = vector.broadcast %cst_90 : f32 to vector<2x128xf32>
    %584 = arith.maximumf %582, %583 : vector<2x128xf32>
    %585 = arith.mulf %584, %584 : vector<2x128xf32>
    %c27_91 = arith.constant 27 : index
    %586 = memref.load %arg3[%c27_91] : memref<32xf32, #tpu.memory_space<smem>>
    %587 = vector.broadcast %586 : f32 to vector<2x128xf32>
    %588 = arith.mulf %585, %587 : vector<2x128xf32>
    %589 = arith.addf %505, %588 : vector<2x128xf32>
    %c84 = arith.constant 84 : index
    %590 = memref.load %arg1[%c84] : memref<96xf32, #tpu.memory_space<smem>>
    %591 = vector.broadcast %590 : f32 to vector<2x128xf32>
    %592 = arith.mulf %1, %591 : vector<2x128xf32>
    %c85 = arith.constant 85 : index
    %593 = memref.load %arg1[%c85] : memref<96xf32, #tpu.memory_space<smem>>
    %594 = vector.broadcast %593 : f32 to vector<2x128xf32>
    %595 = arith.mulf %3, %594 : vector<2x128xf32>
    %596 = arith.addf %592, %595 : vector<2x128xf32>
    %c86 = arith.constant 86 : index
    %597 = memref.load %arg1[%c86] : memref<96xf32, #tpu.memory_space<smem>>
    %598 = vector.broadcast %597 : f32 to vector<2x128xf32>
    %599 = arith.mulf %5, %598 : vector<2x128xf32>
    %600 = arith.addf %596, %599 : vector<2x128xf32>
    %c28_92 = arith.constant 28 : index
    %601 = memref.load %arg2[%c28_92] : memref<32xf32, #tpu.memory_space<smem>>
    %602 = vector.broadcast %601 : f32 to vector<2x128xf32>
    %603 = arith.addf %600, %602 : vector<2x128xf32>
    %cst_93 = arith.constant 0.000000e+00 : f32
    %604 = vector.broadcast %cst_93 : f32 to vector<2x128xf32>
    %605 = arith.maximumf %603, %604 : vector<2x128xf32>
    %606 = arith.mulf %605, %605 : vector<2x128xf32>
    %c28_94 = arith.constant 28 : index
    %607 = memref.load %arg3[%c28_94] : memref<32xf32, #tpu.memory_space<smem>>
    %608 = vector.broadcast %607 : f32 to vector<2x128xf32>
    %609 = arith.mulf %606, %608 : vector<2x128xf32>
    %610 = arith.addf %526, %609 : vector<2x128xf32>
    %c87 = arith.constant 87 : index
    %611 = memref.load %arg1[%c87] : memref<96xf32, #tpu.memory_space<smem>>
    %612 = vector.broadcast %611 : f32 to vector<2x128xf32>
    %613 = arith.mulf %1, %612 : vector<2x128xf32>
    %c88 = arith.constant 88 : index
    %614 = memref.load %arg1[%c88] : memref<96xf32, #tpu.memory_space<smem>>
    %615 = vector.broadcast %614 : f32 to vector<2x128xf32>
    %616 = arith.mulf %3, %615 : vector<2x128xf32>
    %617 = arith.addf %613, %616 : vector<2x128xf32>
    %c89 = arith.constant 89 : index
    %618 = memref.load %arg1[%c89] : memref<96xf32, #tpu.memory_space<smem>>
    %619 = vector.broadcast %618 : f32 to vector<2x128xf32>
    %620 = arith.mulf %5, %619 : vector<2x128xf32>
    %621 = arith.addf %617, %620 : vector<2x128xf32>
    %c29_95 = arith.constant 29 : index
    %622 = memref.load %arg2[%c29_95] : memref<32xf32, #tpu.memory_space<smem>>
    %623 = vector.broadcast %622 : f32 to vector<2x128xf32>
    %624 = arith.addf %621, %623 : vector<2x128xf32>
    %cst_96 = arith.constant 0.000000e+00 : f32
    %625 = vector.broadcast %cst_96 : f32 to vector<2x128xf32>
    %626 = arith.maximumf %624, %625 : vector<2x128xf32>
    %627 = arith.mulf %626, %626 : vector<2x128xf32>
    %c29_97 = arith.constant 29 : index
    %628 = memref.load %arg3[%c29_97] : memref<32xf32, #tpu.memory_space<smem>>
    %629 = vector.broadcast %628 : f32 to vector<2x128xf32>
    %630 = arith.mulf %627, %629 : vector<2x128xf32>
    %631 = arith.addf %547, %630 : vector<2x128xf32>
    %c90 = arith.constant 90 : index
    %632 = memref.load %arg1[%c90] : memref<96xf32, #tpu.memory_space<smem>>
    %633 = vector.broadcast %632 : f32 to vector<2x128xf32>
    %634 = arith.mulf %1, %633 : vector<2x128xf32>
    %c91 = arith.constant 91 : index
    %635 = memref.load %arg1[%c91] : memref<96xf32, #tpu.memory_space<smem>>
    %636 = vector.broadcast %635 : f32 to vector<2x128xf32>
    %637 = arith.mulf %3, %636 : vector<2x128xf32>
    %638 = arith.addf %634, %637 : vector<2x128xf32>
    %c92 = arith.constant 92 : index
    %639 = memref.load %arg1[%c92] : memref<96xf32, #tpu.memory_space<smem>>
    %640 = vector.broadcast %639 : f32 to vector<2x128xf32>
    %641 = arith.mulf %5, %640 : vector<2x128xf32>
    %642 = arith.addf %638, %641 : vector<2x128xf32>
    %c30_98 = arith.constant 30 : index
    %643 = memref.load %arg2[%c30_98] : memref<32xf32, #tpu.memory_space<smem>>
    %644 = vector.broadcast %643 : f32 to vector<2x128xf32>
    %645 = arith.addf %642, %644 : vector<2x128xf32>
    %cst_99 = arith.constant 0.000000e+00 : f32
    %646 = vector.broadcast %cst_99 : f32 to vector<2x128xf32>
    %647 = arith.maximumf %645, %646 : vector<2x128xf32>
    %648 = arith.mulf %647, %647 : vector<2x128xf32>
    %c30_100 = arith.constant 30 : index
    %649 = memref.load %arg3[%c30_100] : memref<32xf32, #tpu.memory_space<smem>>
    %650 = vector.broadcast %649 : f32 to vector<2x128xf32>
    %651 = arith.mulf %648, %650 : vector<2x128xf32>
    %652 = arith.addf %568, %651 : vector<2x128xf32>
    %c93 = arith.constant 93 : index
    %653 = memref.load %arg1[%c93] : memref<96xf32, #tpu.memory_space<smem>>
    %654 = vector.broadcast %653 : f32 to vector<2x128xf32>
    %655 = arith.mulf %1, %654 : vector<2x128xf32>
    %c94 = arith.constant 94 : index
    %656 = memref.load %arg1[%c94] : memref<96xf32, #tpu.memory_space<smem>>
    %657 = vector.broadcast %656 : f32 to vector<2x128xf32>
    %658 = arith.mulf %3, %657 : vector<2x128xf32>
    %659 = arith.addf %655, %658 : vector<2x128xf32>
    %c95 = arith.constant 95 : index
    %660 = memref.load %arg1[%c95] : memref<96xf32, #tpu.memory_space<smem>>
    %661 = vector.broadcast %660 : f32 to vector<2x128xf32>
    %662 = arith.mulf %5, %661 : vector<2x128xf32>
    %663 = arith.addf %659, %662 : vector<2x128xf32>
    %c31_101 = arith.constant 31 : index
    %664 = memref.load %arg2[%c31_101] : memref<32xf32, #tpu.memory_space<smem>>
    %665 = vector.broadcast %664 : f32 to vector<2x128xf32>
    %666 = arith.addf %663, %665 : vector<2x128xf32>
    %cst_102 = arith.constant 0.000000e+00 : f32
    %667 = vector.broadcast %cst_102 : f32 to vector<2x128xf32>
    %668 = arith.maximumf %666, %667 : vector<2x128xf32>
    %669 = arith.mulf %668, %668 : vector<2x128xf32>
    %c31_103 = arith.constant 31 : index
    %670 = memref.load %arg3[%c31_103] : memref<32xf32, #tpu.memory_space<smem>>
    %671 = vector.broadcast %670 : f32 to vector<2x128xf32>
    %672 = arith.mulf %669, %671 : vector<2x128xf32>
    %673 = arith.addf %589, %672 : vector<2x128xf32>
    %674 = arith.addf %610, %631 : vector<2x128xf32>
    %675 = arith.addf %674, %652 : vector<2x128xf32>
    %676 = arith.addf %675, %673 : vector<2x128xf32>
    %c0_104 = arith.constant 0 : index
    %c0_105 = arith.constant 0 : index
    %c0_106 = arith.constant 0 : index
    %677 = vector.load %arg5[%c0_104, %c0_105, %c0_106] : memref<1x2x128xf32, #tpu.memory_space<vmem>>, vector<1x2x128xf32>
    %678 = vector.shape_cast %677 : vector<1x2x128xf32> to vector<2x128xf32>
    %679 = vector.shape_cast %676 : vector<2x128xf32> to vector<1x2x128xf32>
    tpu.vector_store %arg5[%c0_104, %c0_105, %c0_106], %679 {strides = array<i32>} : memref<1x2x128xf32, #tpu.memory_space<vmem>>, vector<1x2x128xf32>,
    return
  }
  func.func @transform_0(%arg0: i32) -> i32 {
    %c0_i32 = arith.constant 0 : i32
    %c0_i32_0 = arith.constant 0 : i32
    return %c0_i32 : i32
  }
  func.func @transform_1(%arg0: i32) -> i32 {
    %c0_i32 = arith.constant 0 : i32
    %c0_i32_0 = arith.constant 0 : i32
    return %c0_i32 : i32
  }
  func.func @transform_2(%arg0: i32) -> i32 {
    %c0_i32 = arith.constant 0 : i32
    %c0_i32_0 = arith.constant 0 : i32
    return %c0_i32 : i32
  }
  func.func @transform_3(%arg0: i32) -> (i32, i32, i32) {
    %c0_i32 = arith.constant 0 : i32
    %c0_i32_0 = arith.constant 0 : i32
    %c0_i32_1 = arith.constant 0 : i32
    return %c0_i32, %arg0, %c0_i32_0 : i32, i32, i32
  }
  func.func @transform_4(%arg0: i32) -> (i32, i32, i32) {
    %c0_i32 = arith.constant 0 : i32
    %c0_i32_0 = arith.constant 0 : i32
    %c0_i32_1 = arith.constant 0 : i32
    return %c0_i32, %arg0, %c0_i32_0 : i32, i32, i32
  }
}

</mosaic_0001>

<bundles_post_ra>
// kernel: mlp_forward.1
= control target key start
LH: loop header
LB: loop body
LE: loop exit
PB: predicated region body
PF: predicated region fallthrough
CT: control target
= control target key end

     0   :  { %s1620_s0 = inlined_call_operand.vmem [shape: f32[96], index: 0, kind: input, shape index: {}]   ;;  %s1621_s1 = inlined_call_operand.vmem [shape: f32[32], index: 1, kind: input, shape index: {}]   ;;  %s1622_s2 = inlined_call_operand.vmem [shape: f32[32], index: 2, kind: input, shape index: {}]   ;;  %s1623_s3 = inlined_call_operand.vmem [shape: f32[3,2,128], index: 3, kind: input, shape index: {}]   ;;  %s1624_s4 = inlined_call_operand.hbm [shape: f32[1,2,128], index: 4, kind: output, shape index: {}]  }
   0x1   :  { %1627 = sst [smem:[#allocation34_spill]] %s1623_s3 }
   0x2   :  { %1628 = sst [smem:[#allocation35_spill]] %s1624_s4 }
   0x3   :  { %9 = vsyncpa [#allocation4], 0 }
   0x4   :  { %10 = vsyncpa [#allocation6], 0  ;;  %s28_s17 = sshll.u32 %s1621_s1, 4  ;;  %s29_s17 = int_to_ptr.vmem [resolvable:$true] %s28_s17 }
   0x5   :  { %11 = vsyncpa [#allocation3], 0  ;;  %s18_s20 = sshll.u32 %s1620_s0, 4  ;;  %s881_s21 = scalar_lea.vmem %s29_s17, 16  ;;  %s19_s20 = int_to_ptr.vmem [resolvable:$true] %s18_s20 }
   0x6   :  { %p882_p0 = scmp.ne.s32.totalorder %s29_s17, %s881_s21  ;;  %p886_p1 = scmp.lt.s32.totalorder %s29_s17, %s29_s17 }
   0x7   :  { %p887_p2 = scmp.lt.s32.totalorder %s881_s21, %s881_s21 }
   0x9   :  { %p888_p3 = por %p887_p2, %p886_p1 }
   0xb   :  { %p889_p4 = pnand %p888_p3, %p882_p0 }
   0xd   :  { %892 = shalt.err (!%p889_p4)
}
   0xe   :  { %s943_s22 = smov [#allocation5]   ;;  %s893_s23 = scalar_lea.vmem %s19_s20, 16 }
   0xf   :  { %31 = dma.vmem_to_smem %s29_s17, 16, %s943_s22, [#allocation6]  }
  0x10   :  { %p894_p5 = scmp.ne.s32.totalorder %s19_s20, %s893_s23  ;;  %p898_p6 = scmp.lt.s32.totalorder %s19_s20, %s19_s20 }
  0x11   :  { %p899_p7 = scmp.lt.s32.totalorder %s893_s23, %s893_s23 }
  0x13   :  { %p900_p8 = por %p899_p7, %p898_p6 }
  0x15   :  { %p901_p9 = pnand %p900_p8, %p894_p5 }
  0x17   :  { %904 = shalt.err (!%p901_p9)
}
  0x18   :  { %s944_s1 = smov [#allocation2]   ;;  %s38_s25 = sshll.u32 %s1622_s2, 4  ;;  %s39_s25 = int_to_ptr.vmem [resolvable:$true] %s38_s25 }
  0x19   :  { %21 = dma.vmem_to_smem %s19_s20, 16, %s944_s1, [#allocation4]  }
  0x1a   :  { %s905_s26 = scalar_lea.vmem %s39_s25, 16  ;;  %p910_p11 = scmp.lt.s32.totalorder %s39_s25, %s39_s25 }
  0x1b   :  { %p906_p10 = scmp.ne.s32.totalorder %s39_s25, %s905_s26  ;;  %p911_p12 = scmp.lt.s32.totalorder %s905_s26, %s905_s26 }
  0x1d   :  { %p912_p13 = por %p911_p12, %p910_p11 }
  0x1f   :  { %p913_p0 = pnand %p912_p13, %p906_p10 }
  0x21   :  { %916 = shalt.err (!%p913_p0)
}
  0x22   :  { %s945_s27 = smov [#allocation7]  }
  0x23   :  { %41 = dma.vmem_to_smem %s39_s25, 16, %s945_s27, [#allocation6]  }
  0x24   :  { %937 = dma.done.wait [#allocation4], 16  }
  0x25   :  { %938 = vsyncadd [#allocation4], 4294967280 }
  0x26   :  { %939 = dma.done.wait [#allocation6], 32  }
  0x27   :  { %940 = vsyncadd [#allocation6], 4294967264 }
  0x28   :  { %53 = sfence }
  0x29   :  { %s981_s28 = sld [smem:[#allocation2]]  ;;  %v1072_v0 = vld [vmem:[%s1623_s3] sm:$0x3]  ;;  %v1077_v1 = vld [vmem:[%s1623_s3 + $0x2] sm:$0x3] }
  0x2a   :  { %s983_s29 = sld [smem:[#allocation2 + $0x1]]  ;;  %v1096_v8 = vld [vmem:[%s1623_s3 + $0x4] sm:$0x3] }
  0x2b   :  { %s985_s2 = sld [smem:[#allocation2 + $0x2]] }
  0x2c   :  { %s987_s30 = sld [smem:[#allocation5]] }
  0x2d   :  { %s989_s5 = sld [smem:[#allocation7]] }
  0x2e   :  { %s991_s6 = sld [smem:[#allocation2 + $0x3]] }
  0x2f   :  { %s993_s7 = sld [smem:[#allocation2 + $0x4]]  ;;  %v60_v2 = vstv %s981_s28 }
  0x30   :  { %s995_s8 = sld [smem:[#allocation2 + $0x5]]  ;;  %v63_v3 = vstv %s983_s29  ;;  %v61_v6 = vmul.f32 %v60_v2, %v1072_v0 }
  0x31   :  { %s997_s9 = sld [smem:[#allocation5 + $0x1]]  ;;  %v64_v7 = vmul.f32 %v1077_v1, %v63_v3  ;;  %v67_v9 = vstv %s985_s2 }
  0x32   :  { %s999_s10 = sld [smem:[#allocation7 + $0x1]]  ;;  %v68_v14 = vmul.f32 %v1096_v8, %v67_v9  ;;  %v71_v19 = vstv %s987_s30 }
  0x33   :  { %1629 = sst [smem:[#allocation12_spill]] %s989_s5  ;;  %v65_v13 = vadd.f32 %v64_v7, %v61_v6 }
  0x34   :  { %s1001_s11 = sld [smem:[#allocation2 + $0x6]]  ;;  %v79_v4 = vstv %s991_s6 }
  0x35   :  { %s1003_s12 = sld [smem:[#allocation2 + $0x7]]  ;;  %v82_v5 = vstv %s993_s7  ;;  %v80_v10 = vmul.f32 %v79_v4, %v1072_v0  ;;  %v69_v22 = vadd.f32 %v68_v14, %v65_v13 }
  0x36   :  { %s1005_s13 = sld [smem:[#allocation2 + $0x8]]  ;;  %v83_v11 = vmul.f32 %v1077_v1, %v82_v5  ;;  %v86_v12 = vstv %s995_s8 }
  0x37   :  { %s1007_s14 = sld [smem:[#allocation5 + $0x2]]  ;;  %v87_v16 = vmul.f32 %v1096_v8, %v86_v12  ;;  %v90_v23 = vstv %s997_s9  ;;  %v72_v37 = vadd.f32 %v71_v19, %v69_v22 }
  0x38   :  { %1630 = sst [smem:[#allocation13_spill]] %s999_s10  ;;  %v84_v15 = vadd.f32 %v83_v11, %v80_v10 }
  0x39   :  { %s1009_s15 = sld [smem:[#allocation7 + $0x2]]  ;;  %v73_v53 = vmax.f32 %v72_v37, 0.0 }
  0x3a   :  { %s1011_s16 = sld [smem:[#allocation2 + $0x9]]  ;;  %v98_v17 = vstv %s1001_s11  ;;  %v88_v26 = vadd.f32 %v87_v16, %v84_v15 }
  0x3b   :  { %s1013_s17 = sld [smem:[#allocation2 + $0xa]]  ;;  %v101_v18 = vstv %s1003_s12  ;;  %v99_v27 = vmul.f32 %v98_v17, %v1072_v0  ;;  %v74_v12 = vmul.f32 %v73_v53, %v73_v53 }
  0x3c   :  { %s1015_s18 = sld [smem:[#allocation2 + $0xb]]  ;;  %v102_v28 = vmul.f32 %v1077_v1, %v101_v18  ;;  %v105_v29 = vstv %s1005_s13  ;;  %v91_v41 = vadd.f32 %v90_v23, %v88_v26 }
  0x3d   :  { %1631 = sst [smem:[#allocation14_spill]] %s1007_s14  ;;  %v106_v42 = vmul.f32 %v1096_v8, %v105_v29 }
  0x3e   :  { %s1017_s19 = sld [smem:[#allocation5 + $0x3]]  ;;  %v103_v45 = vadd.f32 %v102_v28, %v99_v27  ;;  %v92_v61 = vmax.f32 %v91_v41, 0.0 }
  0x3f   :  { %1632 = sst [smem:[#allocation15_spill]] %s1009_s15 }
  0x40   :  { %s1019_s20 = sld [smem:[#allocation7 + $0x3]]  ;;  %v117_v30 = vstv %s1011_s16  ;;  %v107_v62 = vadd.f32 %v106_v42, %v103_v45  ;;  %v93_v16 = vmul.f32 %v92_v61, %v92_v61 }
  0x41   :  { %s1021_s21 = sld [smem:[#allocation2 + $0xc]]  ;;  %v120_v31 = vstv %s1013_s17  ;;  %v118_v43 = vmul.f32 %v117_v30, %v1072_v0 }
  0x42   :  { %1633 = sst [smem:[#allocation16_spill]] %s1015_s18  ;;  %v121_v44 = vmul.f32 %v1077_v1, %v120_v31 }
  0x43   :  { %s1023_s22 = sld [smem:[#allocation2 + $0xd]] }
  0x44   :  { %1634 = sst [smem:[#allocation17_spill]] %s1017_s19  ;;  %v122_v57 = vadd.f32 %v121_v44, %v118_v43 }
  0x45   :  { %s1025_s23 = sld [smem:[#allocation2 + $0xe]] }
  0x46   :  { %1635 = sst [smem:[#allocation18_spill]] %s1019_s20 }
  0x47   :  { %s1027_s1 = sld [smem:[#allocation5 + $0x4]]  ;;  %v136_v20 = vstv %s1021_s21 }
  0x48   :  { %s1029_s0 = sld [smem:[#allocation7 + $0x4]]  ;;  %v137_v32 = vmul.f32 %v136_v20, %v1072_v0 }
  0x49   :  { %s1031_s24 = sld [smem:[#allocation2 + $0xf]]  ;;  %v139_v21 = vstv %s1023_s22 }
  0x4a   :  { %s1033_s25 = sld [smem:[#allocation2 + $0x10]]  ;;  %v140_v33 = vmul.f32 %v1077_v1, %v139_v21 }
  0x4b   :  { %s1035_s26 = sld [smem:[#allocation2 + $0x11]]  ;;  %v143_v34 = vstv %s1025_s23 }
  0x4c   :  { %s1037_s27 = sld [smem:[#allocation5 + $0x5]]  ;;  %v141_v47 = vadd.f32 %v140_v33, %v137_v32  ;;  %v144_v48 = vmul.f32 %v1096_v8, %v143_v34 }
  0x4d   :  { %1636 = sst [smem:[#allocation19_spill]] %s1027_s1 }
  0x4e   :  { %1637 = sst [smem:[#allocation20_spill]] %s1029_s0  ;;  %v145_v63 = vadd.f32 %v144_v48, %v141_v47 }
  0x4f   :  { %s1039_s4 = sld [smem:[#allocation7 + $0x5]]  ;;  %v156_v24 = vstv %s1031_s24 }
  0x50   :  { %s1041_s20 = sld [smem:[#allocation2 + $0x12]]  ;;  %v159_v25 = vstv %s1033_s25  ;;  %v157_v35 = vmul.f32 %v156_v24, %v1072_v0 }
  0x51   :  { %s1043_s15 = sld [smem:[#allocation2 + $0x13]]  ;;  %v160_v36 = vmul.f32 %v1077_v1, %v159_v25  ;;  %v163_v38 = vstv %s1035_s26 }
  0x52   :  { %1638 = sst [smem:[#allocation21_spill]] %s1037_s27  ;;  %v164_v50 = vmul.f32 %v1096_v8, %v163_v38 }
  0x53   :  { %s1045_s19 = sld [smem:[#allocation2 + $0x14]]  ;;  %v161_v49 = vadd.f32 %v160_v36, %v157_v35 }
  0x54   :  { %s1047_s10 = sld [smem:[#allocation5 + $0x6]] }
  0x55   :  { %1639 = sst [smem:[#allocation22_spill]] %s1039_s4  ;;  %v165_v3 = vadd.f32 %v164_v50, %v161_v49 }
  0x56   :  { %1640 = sst [smem:[#allocation23_spill]] %s1041_s20 }
  0x57   :  { %1641 = sst [smem:[#allocation24_spill]] %s1043_s15 }
  0x58   :  { %s1049_s0 = sld [smem:[#allocation7 + $0x6]] }
  0x59   :  { %1642 = sst [smem:[#allocation25_spill]] %s1045_s19 }
  0x5a   :  { %1643 = sst [smem:[#allocation26_spill]] %s1047_s10 }
  0x5b   :  { %s1051_s1 = sld [smem:[#allocation2 + $0x15]] }
  0x5c   :  { %s1053_s14 = sld [smem:[#allocation2 + $0x16]] }
  0x5d   :  { %s1055_s27 = sld [smem:[#allocation2 + $0x17]] }
  0x5e   :  { %1644 = sst [smem:[#allocation27_spill]] %s1049_s0 }
  0x5f   :  { %s1057_s4 = sld [smem:[#allocation5 + $0x7]] }
  0x60   :  { %s1059_s5 = sld [smem:[#allocation7 + $0x7]] }
  0x61   :  { %s1061_s18 = sld [smem:[#allocation2 + $0x18]]  ;;  %v196_v59 = vstv %s1051_s1 }
  0x62   :  { %1645 = sst [smem:[#allocation28_spill]] %s1053_s14  ;;  %v197_v7 = vmul.f32 %v196_v59, %v1072_v0 }
  0x63   :  { %1646 = sst [smem:[#allocation29_spill]] %s1055_s27 }
  0x64   :  { %s1063_s15 = sld [smem:[#allocation2 + $0x19]] }
  0x65   :  { %1647 = sst [smem:[#allocation30_spill]] %s1057_s4 }
  0x66   :  { %1648 = sst [smem:[#allocation31_spill]] %s1059_s5 }
  0x67   :  { %s1065_s10 = sld [smem:[#allocation2 + $0x1a]]  ;;  %v216_v10 = vstv %s1061_s18 }
  0x68   :  { %s1067_s19 = sld [smem:[#allocation5 + $0x8]]  ;;  %v217_v22 = vmul.f32 %v216_v10, %v1072_v0 }
  0x69   :  { %s1081_s5 = sld [smem:[#allocation7 + $0x8]] }
  0x6a   :  { %s1085_s4 = sld [smem:[#allocation2 + $0x1b]]  ;;  %v219_v11 = vstv %s1063_s15 }
  0x6b   :  { %s1091_s20 = sld [smem:[#allocation2 + $0x1d]]  ;;  %v220_v23 = vmul.f32 %v1077_v1, %v219_v11 }
  0x6c   :  { %s1101_s28 = sld [smem:[#allocation5 + $0x9]] }
  0x6d   :  { %s1104_s29 = sld [smem:[#allocation7 + $0x9]]  ;;  %v223_v27 = vstv %s1065_s10  ;;  %v221_v38 = vadd.f32 %v220_v23, %v217_v22 }
  0x6e   :  { %1649 = sst [smem:[#allocation32_spill]] %s1067_s19 }
  0x6f   :  { %s1087_s19 = sld [smem:[#allocation2 + $0x1c]] }
  0x70   :  { %s1106_s6 = sld [smem:[#allocation2 + $0x1e]]  ;;  %v236_v30 = vstv %s1085_s4 }
  0x71   :  { %s1109_s2 = sld [smem:[#allocation2 + $0x1f]]  ;;  %v237_v42 = vmul.f32 %v236_v30, %v1072_v0  ;;  %v243_v47 = vstv %s1091_s20 }
  0x72   :  { %s1112_s7 = sld [smem:[#allocation2 + $0x20]]  ;;  %v244_v59 = vmul.f32 %v1096_v8, %v243_v47 }
  0x73   :  { %s1116_s8 = sld [smem:[#allocation5 + $0xa]] }
  0x74   :  { %s1121_s27 = sld [smem:[#allocation7 + $0xa]] }
  0x75   :  { %s1126_s14 = sld [smem:[#allocation2 + $0x21]]  ;;  %v239_v31 = vstv %s1087_s19 }
  0x76   :  { %s1651_s11 = sld [smem:[#allocation23_spill]]  ;;  %v240_v43 = vmul.f32 %v1077_v1, %v239_v31  ;;  %v256_v48 = vstv %s1106_s6 }
  0x77   :  { %s1652_s12 = sld [smem:[#allocation24_spill]]  ;;  %v259_v49 = vstv %s1109_s2 }
  0x78   :  { %s1131_s30 = sld [smem:[#allocation2 + $0x22]]  ;;  %v260_v61 = vmul.f32 %v1077_v1, %v259_v49 }
  0x79   :  { %s1137_s9 = sld [smem:[#allocation2 + $0x23]] }
  0x7a   :  { %1650 = sst [smem:[#allocation33_spill]] %s1121_s27 }
  0x7b   :  { %s1653_s21 = sld [smem:[#allocation16_spill]]  ;;  %v276_v50 = vstv %s1126_s14 }
  0x7c   :  { %s1142_s22 = sld [smem:[#allocation5 + $0xb]]  ;;  %v176_v39 = vstv %s1651_s11 }
  0x7d   :  { %v179_v40 = vstv %s1652_s12  ;;  %s1147_s13 = sld [smem:[#allocation7 + $0xb]]  ;;  %v177_v51 = vmul.f32 %v176_v39, %v1072_v0  ;;  %v224_v39 = vmul.f32 %v1096_v8, %v223_v27 }
  0x7e   :  { %s1655_s16 = sld [smem:[#allocation12_spill]]  ;;  %v180_v52 = vmul.f32 %v1077_v1, %v179_v40 }
  0x7f   :  { %s1656_s17 = sld [smem:[#allocation14_spill]] }
  0x80   :  { %s1657_s23 = sld [smem:[#allocation25_spill]]  ;;  %v181_v5 = vadd.f32 %v180_v52, %v177_v51  ;;  %v279_v51 = vstv %s1131_s30 }
  0x81   :  { %s1152_s24 = sld [smem:[#allocation2 + $0x24]]  ;;  %v124_v46 = vstv %s1653_s21 }
  0x82   :  { %s1658_s25 = sld [smem:[#allocation28_spill]]  ;;  %v125_v58 = vmul.f32 %v1096_v8, %v124_v46 }
  0x83   :  { %1654 = sst [smem:[#allocation23_spill]] %s1147_s13 }
  0x84   :  { %s1156_s26 = sld [smem:[#allocation2 + $0x25]]  ;;  %v76_v54 = vstv %s1655_s16  ;;  %v126_v14 = vadd.f32 %v125_v58, %v122_v57  ;;  %v241_v58 = vadd.f32 %v240_v43, %v237_v42 }
  0x85   :  { %s1659_s0 = sld [smem:[#allocation19_spill]]  ;;  %v109_v55 = vstv %s1656_s17  ;;  %v1202_v28 = vmul.f32 %v76_v54, %v74_v12 }
  0x86   :  { %s1161_s11 = sld [smem:[#allocation2 + $0x26]]  ;;  %v183_v56 = vstv %s1657_s23  ;;  %v110_v17 = vadd.f32 %v109_v55, %v107_v62  ;;  %v225_v55 = vadd.f32 %v224_v39, %v221_v38  ;;  %v277_v62 = vmul.f32 %v276_v50, %v1072_v0 }
  0x87   :  { %s1660_s12 = sld [smem:[#allocation21_spill]]  ;;  %v184_v6 = vmul.f32 %v1096_v8, %v183_v56  ;;  %v296_v23 = vstv %s1152_s24 }
  0x88   :  { %s1166_s21 = sld [smem:[#allocation5 + $0xc]]  ;;  %v199_v60 = vstv %s1658_s25  ;;  %v111_v33 = vmax.f32 %v110_v17, 0.0 }
  0x89   :  { %s1171_s3 = sld [smem:[#allocation7 + $0xc]]  ;;  %v200_v9 = vmul.f32 %v1077_v1, %v199_v60  ;;  %v185_v21 = vadd.f32 %v184_v6, %v181_v5  ;;  %v257_v60 = vmul.f32 %v256_v48, %v1072_v0  ;;  %v283_v5 = vstv %s1137_s9 }
  0x8a   :  { %s1662_s13 = sld [smem:[#allocation13_spill]] }
  0x8b   :  { %s1663_s27 = sld [smem:[#allocation29_spill]]  ;;  %v147_v2 = vstv %s1659_s0  ;;  %v201_v25 = vadd.f32 %v200_v9, %v197_v7 }
  0x8c   :  { %s1174_s16 = sld [smem:[#allocation2 + $0x27]]  ;;  %v148_v19 = vadd.f32 %v147_v2, %v145_v63  ;;  %v280_v63 = vmul.f32 %v1077_v1, %v279_v51  ;;  %v112_v2 = vmul.f32 %v111_v33, %v111_v33  ;;  %v303_v38 = vstv %s1161_s11 }
  0x8d   :  { %v167_v4 = vstv %s1660_s12  ;;  %s1664_s17 = sld [smem:[#allocation17_spill]]  ;;  %v304_v50 = vmul.f32 %v1096_v8, %v303_v38 }
  0x8e   :  { %s1178_s23 = sld [smem:[#allocation2 + $0x28]]  ;;  %v168_v20 = vadd.f32 %v167_v4, %v165_v3  ;;  %v149_v35 = vmax.f32 %v148_v19, 0.0  ;;  %v263_v4 = vstv %s1112_s7  ;;  %v281_v17 = vadd.f32 %v280_v63, %v277_v62 }
  0x8f   :  { %1661 = sst [smem:[#allocation24_spill]] %s1171_s3  ;;  %v252_v62 = vstv %s1104_s29 }
  0x90   :  { %s1184_s1 = sld [smem:[#allocation2 + $0x29]]  ;;  %v95_v13 = vstv %s1662_s13  ;;  %v169_v36 = vmax.f32 %v168_v20, 0.0  ;;  %v150_v52 = vmul.f32 %v149_v35, %v149_v35  ;;  %v287_v35 = vstv %s1142_s22 }
  0x91   :  { %s1665_s25 = sld [smem:[#allocation26_spill]]  ;;  %v203_v15 = vstv %s1663_s27  ;;  %v1208_v32 = vmul.f32 %v95_v13, %v93_v16  ;;  %v245_v13 = vadd.f32 %v244_v59, %v241_v58  ;;  %v264_v16 = vmul.f32 %v1096_v8, %v263_v4 }
  0x92   :  { %s1188_s0 = sld [smem:[#allocation5 + $0xd]]  ;;  %v204_v26 = vmul.f32 %v1096_v8, %v203_v15  ;;  %v170_v53 = vmul.f32 %v169_v36, %v169_v36  ;;  %v261_v15 = vadd.f32 %v260_v61, %v257_v60  ;;  %v316_v39 = vstv %s1174_s16 }
  0x93   :  { %v128_v18 = vstv %s1664_s17  ;;  %s1191_s12 = sld [smem:[#allocation7 + $0xd]]  ;;  %v317_v51 = vmul.f32 %v316_v39, %v1072_v0  ;;  %v307_v4 = vstv %s1166_s21 }
  0x94   :  { %s1667_s15 = sld [smem:[#allocation15_spill]]  ;;  %v129_v29 = vadd.f32 %v128_v18, %v126_v14  ;;  %v205_v41 = vadd.f32 %v204_v26, %v201_v25  ;;  %v247_v14 = vstv %s1101_s28  ;;  %v284_v18 = vmul.f32 %v1096_v8, %v283_v5 }
  0x95   :  { %s1195_s18 = sld [smem:[#allocation2 + $0x2a]]  ;;  %v265_v33 = vadd.f32 %v264_v16, %v261_v15 }
  0x96   :  { %s1200_s27 = sld [smem:[#allocation2 + $0x2b]]  ;;  %v130_v44 = vmax.f32 %v129_v29, 0.0  ;;  %v248_v29 = vadd.f32 %v247_v14, %v245_v13 }
  0x97   :  { %v187_v24 = vstv %s1665_s25  ;;  %s1668_s13 = sld [smem:[#allocation20_spill]] }
  0x98   :  { %s1206_s17 = sld [smem:[#allocation2 + $0x2c]]  ;;  %v188_v37 = vadd.f32 %v187_v24, %v185_v21  ;;  %v131_v6 = vmul.f32 %v130_v44, %v130_v44  ;;  %v299_v24 = vstv %s1156_s26  ;;  %v249_v42 = vmax.f32 %v248_v29, 0.0 }
  0x99   :  { %1666 = sst [smem:[#allocation16_spill]] %s1191_s12  ;;  %v300_v36 = vmul.f32 %v1077_v1, %v299_v24  ;;  %v327_v24 = vstv %s1188_s0 }
  0x9a   :  { %s1669_s12 = sld [smem:[#allocation22_spill]]  ;;  %v114_v34 = vstv %s1667_s15  ;;  %v189_v54 = vmax.f32 %v188_v37, 0.0 }
  0x9b   :  { %s1670_s3 = sld [smem:[#allocation30_spill]]  ;;  %v115_v19 = vmul.f32 %v114_v34, %v112_v2  ;;  %v285_v34 = vadd.f32 %v284_v18, %v281_v17  ;;  %v336_v43 = vstv %s1195_s18 }
  0x9c   :  { %s1211_s25 = sld [smem:[#allocation5 + $0xe]]  ;;  %v190_v11 = vmul.f32 %v189_v54, %v189_v54  ;;  %v339_v44 = vstv %s1200_s27  ;;  %v323_v54 = vstv %s1184_s1 }
  0x9d   :  { %s1214_s4 = sld [smem:[#allocation7 + $0xe]]  ;;  %v152_v40 = vstv %s1668_s13  ;;  %v288_v48 = vadd.f32 %v287_v35, %v285_v34 }
  0x9e   :  { %s1219_s10 = sld [smem:[#allocation2 + $0x2d]]  ;;  %v153_v7 = vmul.f32 %v152_v40, %v150_v52  ;;  %v319_v40 = vstv %s1178_s23  ;;  %v343_v58 = vstv %s1206_s17 }
  0x9f   :  { %s1673_s19 = sld [smem:[#allocation32_spill]]  ;;  %v320_v52 = vmul.f32 %v1077_v1, %v319_v40  ;;  %v289_v2 = vmax.f32 %v288_v48, 0.0 }
  0xa0   :  { %v172_v45 = vstv %s1669_s12  ;;  %s1224_s15 = sld [smem:[#allocation2 + $0x2e]]  ;;  %v154_v25 = vadd.f32 %v153_v7, %v1202_v28  ;;  %v267_v28 = vstv %s1116_s8 }
  0xa1   :  { %v207_v46 = vstv %s1670_s3  ;;  %s1674_s13 = sld [smem:[#allocation18_spill]]  ;;  %v173_v9 = vmul.f32 %v172_v45, %v170_v53  ;;  %v268_v47 = vadd.f32 %v267_v28, %v265_v33  ;;  %v321_v5 = vadd.f32 %v320_v52, %v317_v51 }
  0xa2   :  { %1671 = sst [smem:[#allocation12_spill]] %s1211_s25  ;;  %v208_v56 = vadd.f32 %v207_v46, %v205_v41  ;;  %v232_v41 = vstv %s1081_s5  ;;  %v290_v17 = vmul.f32 %v289_v2, %v289_v2 }
  0xa3   :  { %1672 = sst [smem:[#allocation14_spill]] %s1214_s4  ;;  %v1267_v26 = vadd.f32 %v173_v9, %v1208_v32  ;;  %v297_v32 = vmul.f32 %v296_v23, %v1072_v0  ;;  %v269_v63 = vmax.f32 %v268_v47, 0.0  ;;  %v344_v9 = vmul.f32 %v1096_v8, %v343_v58 }
  0xa4   :  { %s1230_s4 = sld [smem:[#allocation2 + $0x2f]]  ;;  %v209_v12 = vmax.f32 %v208_v56, 0.0  ;;  %v340_v56 = vmul.f32 %v1077_v1, %v339_v44  ;;  %v356_v59 = vstv %s1219_s10 }
  0xa5   :  { %s1232_s25 = sld [smem:[#allocation5 + $0xf]]  ;;  %v227_v57 = vstv %s1673_s19  ;;  %v301_v49 = vadd.f32 %v300_v36, %v297_v32  ;;  %v270_v16 = vmul.f32 %v269_v63, %v269_v63 }
  0xa6   :  { %s1236_s3 = sld [smem:[#allocation7 + $0xf]]  ;;  %v228_v10 = vadd.f32 %v227_v57, %v225_v55  ;;  %v210_v31 = vmul.f32 %v209_v12, %v209_v12  ;;  %v337_v55 = vmul.f32 %v336_v43, %v1072_v0  ;;  %v250_v57 = vmul.f32 %v249_v42, %v249_v42 }
  0xa7   :  { %s1242_s20 = sld [smem:[#allocation2 + $0x30]]  ;;  %v133_v3 = vstv %s1674_s13  ;;  %v359_v60 = vstv %s1224_s15 }
  0xa8   :  { %s1247_s6 = sld [smem:[#allocation2 + $0x31]]  ;;  %v134_v21 = vmul.f32 %v133_v3, %v131_v6  ;;  %v229_v22 = vmax.f32 %v228_v10, 0.0  ;;  %v305_v3 = vadd.f32 %v304_v50, %v301_v49  ;;  %v324_v6 = vmul.f32 %v1096_v8, %v323_v54 }
  0xa9   :  { %s1675_s2 = sld [smem:[#allocation27_spill]]  ;;  %v341_v7 = vadd.f32 %v340_v56, %v337_v55  ;;  %v357_v10 = vmul.f32 %v356_v59, %v1072_v0  ;;  %v253_v13 = vmul.f32 %v252_v62, %v250_v57 }
  0xaa   :  { %s1249_s14 = sld [smem:[#allocation2 + $0x32]]  ;;  %v230_v37 = vmul.f32 %v229_v22, %v229_v22  ;;  %v363_v15 = vstv %s1230_s4 }
  0xab   :  { %s1252_s30 = sld [smem:[#allocation5 + $0x10]]  ;;  %v364_v29 = vmul.f32 %v1096_v8, %v363_v15  ;;  %v1348_v28 = vadd.f32 %v253_v13, %v1267_v26  ;;  %v367_v50 = vstv %s1232_s25 }
  0xac   :  { %s1676_s12 = sld [smem:[#allocation31_spill]]  ;;  %v233_v53 = vmul.f32 %v232_v41, %v230_v37 }
  0xad   :  { %s1256_s7 = sld [smem:[#allocation7 + $0x10]]  ;;  %v376_v18 = vstv %s1242_s20 }
  0xae   :  { %s1259_s9 = sld [smem:[#allocation2 + $0x33]]  ;;  %v1323_v12 = vadd.f32 %v233_v53, %v154_v25  ;;  %v345_v25 = vadd.f32 %v344_v9, %v341_v7  ;;  %v377_v33 = vmul.f32 %v376_v18, %v1072_v0 }
  0xaf   :  { %v192_v20 = vstv %s1675_s2  ;;  %s1263_s28 = sld [smem:[#allocation2 + $0x34]] }
  0xb0   :  { %s1270_s19 = sld [smem:[#allocation2 + $0x35]]  ;;  %v193_v30 = vmul.f32 %v192_v20, %v190_v11  ;;  %v360_v11 = vmul.f32 %v1077_v1, %v359_v60  ;;  %v308_v20 = vadd.f32 %v307_v4, %v305_v3  ;;  %v383_v35 = vstv %s1249_s14 }
  0xb1   :  { %s1272_s24 = sld [smem:[#allocation5 + $0x11]]  ;;  %v387_v4 = vstv %s1252_s30 }
  0xb2   :  { %v212_v27 = vstv %s1676_s12  ;;  %s1278_s26 = sld [smem:[#allocation7 + $0x11]]  ;;  %v1290_v45 = vadd.f32 %v193_v30, %v115_v19  ;;  %v379_v19 = vstv %s1247_s6  ;;  %v309_v38 = vmax.f32 %v308_v20, 0.0 }
  0xb3   :  { %s1283_s13 = sld [smem:[#allocation2 + $0x36]]  ;;  %v213_v46 = vmul.f32 %v212_v27, %v210_v31  ;;  %v361_v27 = vadd.f32 %v360_v11, %v357_v10  ;;  %v380_v34 = vmul.f32 %v1077_v1, %v379_v19 }
  0xb4   :  { %s1288_s2 = sld [smem:[#allocation2 + $0x37]]  ;;  %v396_v22 = vstv %s1259_s9  ;;  %v310_v53 = vmul.f32 %v309_v38, %v309_v38 }
  0xb5   :  { %s1292_s8 = sld [smem:[#allocation2 + $0x38]]  ;;  %v1309_v61 = vadd.f32 %v213_v46, %v134_v21  ;;  %v325_v21 = vadd.f32 %v324_v6, %v321_v5  ;;  %v399_v23 = vstv %s1263_s28  ;;  %v397_v32 = vmul.f32 %v396_v22, %v1072_v0 }
  0xb6   :  { %s1297_s5 = sld [smem:[#allocation5 + $0x12]]  ;;  %v400_v36 = vmul.f32 %v1077_v1, %v399_v23  ;;  %v403_v40 = vstv %s1270_s19  ;;  %v365_v43 = vadd.f32 %v364_v29, %v361_v27  ;;  %v381_v44 = vadd.f32 %v380_v34, %v377_v33 }
  0xb7   :  { %s1302_s22 = sld [smem:[#allocation7 + $0x12]]  ;;  %v328_v39 = vadd.f32 %v327_v24, %v325_v21  ;;  %v384_v46 = vmul.f32 %v1096_v8, %v383_v35  ;;  %v404_v52 = vmul.f32 %v1096_v8, %v403_v40  ;;  %v407_v9 = vstv %s1272_s24 }
  0xb8   :  { %s1307_s11 = sld [smem:[#allocation2 + $0x39]]  ;;  %v401_v51 = vadd.f32 %v400_v36, %v397_v32  ;;  %v368_v63 = vadd.f32 %v367_v50, %v365_v43  ;;  %v372_v50 = vstv %s1236_s3 }
  0xb9   :  { %s1677_s16 = sld [smem:[#allocation33_spill]]  ;;  %v416_v47 = vstv %s1283_s13  ;;  %v329_v54 = vmax.f32 %v328_v39, 0.0  ;;  %v385_v2 = vadd.f32 %v384_v46, %v381_v44 }
  0xba   :  { %s1312_s23 = sld [smem:[#allocation2 + $0x3a]]  ;;  %v419_v48 = vstv %s1288_s2  ;;  %v417_v57 = vmul.f32 %v416_v47, %v1072_v0  ;;  %v405_v5 = vadd.f32 %v404_v52, %v401_v51  ;;  %v369_v22 = vmax.f32 %v368_v63, 0.0 }
  0xbb   :  { %s1316_s1 = sld [smem:[#allocation2 + $0x3b]]  ;;  %v420_v58 = vmul.f32 %v1077_v1, %v419_v48  ;;  %v423_v3 = vstv %s1292_s8  ;;  %v330_v18 = vmul.f32 %v329_v54, %v329_v54  ;;  %v388_v21 = vadd.f32 %v387_v4, %v385_v2 }
  0xbc   :  { %s1321_s29 = sld [smem:[#allocation5 + $0x13]]  ;;  %v408_v23 = vadd.f32 %v407_v9, %v405_v5  ;;  %v427_v40 = vstv %s1297_s5  ;;  %v392_v52 = vstv %s1256_s7 }
  0xbd   :  { %s1327_s21 = sld [smem:[#allocation7 + $0x13]]  ;;  %v421_v15 = vadd.f32 %v420_v58, %v417_v57  ;;  %v389_v39 = vmax.f32 %v388_v21, 0.0  ;;  %v412_v57 = vstv %s1278_s26  ;;  %v432_v4 = vstv %s1302_s22 }
  0xbe   :  { %s1678_s18 = sld [smem:[#allocation23_spill]]  ;;  %v436_v55 = vstv %s1307_s11 }
  0xbf   :  { %v272_v14 = vstv %s1677_s16  ;;  %s1679_s27 = sld [smem:[#allocation12_spill]]  ;;  %v437_v6 = vmul.f32 %v436_v55, %v1072_v0  ;;  %v390_v51 = vmul.f32 %v389_v39, %v389_v39 }
  0xc0   :  { %s1331_s17 = sld [smem:[#allocation2 + $0x3c]]  ;;  %v1355_v37 = vmul.f32 %v272_v14, %v270_v16  ;;  %v439_v56 = vstv %s1312_s23  ;;  %v424_v16 = vmul.f32 %v1096_v8, %v423_v3 }
  0xc1   :  { %s1335_s10 = sld [smem:[#allocation2 + $0x3d]]  ;;  %v440_v7 = vmul.f32 %v1077_v1, %v439_v56  ;;  %v443_v10 = vstv %s1316_s1  ;;  %v393_v3 = vmul.f32 %v392_v52, %v390_v51 }
  0xc2   :  { %s1339_s4 = sld [smem:[#allocation2 + $0x3e]]  ;;  %v274_v33 = vadd.f32 %v1355_v37, %v1290_v45  ;;  %v425_v32 = vadd.f32 %v424_v16, %v421_v15  ;;  %v409_v45 = vmax.f32 %v408_v23, 0.0 }
  0xc3   :  { %s1680_s15 = sld [smem:[#allocation24_spill]]  ;;  %v441_v24 = vadd.f32 %v440_v7, %v437_v6 }
  0xc4   :  { %v292_v30 = vstv %s1678_s18  ;;  %s1345_s20 = sld [smem:[#allocation5 + $0x14]]  ;;  %v428_v44 = vadd.f32 %v427_v40, %v425_v32 }
  0xc5   :  { %v347_v31 = vstv %s1679_s27  ;;  %s1353_s0 = sld [smem:[#allocation7 + $0x14]]  ;;  %v293_v26 = vmul.f32 %v292_v30, %v290_v17 }
  0xc6   :  { %s1681_s6 = sld [smem:[#allocation16_spill]]  ;;  %v348_v42 = vadd.f32 %v347_v31, %v345_v25  ;;  %v456_v59 = vstv %s1331_s17  ;;  %v444_v25 = vmul.f32 %v1096_v8, %v443_v10  ;;  %v429_v63 = vmax.f32 %v428_v44, 0.0 }
  0xc7   :  { %s1358_s12 = sld [smem:[#allocation2 + $0x3f]]  ;;  %v459_v60 = vstv %s1335_s10  ;;  %v457_v11 = vmul.f32 %v456_v59, %v1072_v0  ;;  %v1415_v34 = vadd.f32 %v293_v26, %v1309_v61  ;;  %v370_v26 = vmul.f32 %v369_v22, %v369_v22 }
  0xc8   :  { %s1361_s14 = sld [smem:[#allocation2 + $0x40]]  ;;  %v349_v62 = vmax.f32 %v348_v42, 0.0  ;;  %v460_v13 = vmul.f32 %v1077_v1, %v459_v60  ;;  %v463_v17 = vstv %s1339_s4  ;;  %v445_v61 = vadd.f32 %v444_v25, %v441_v24 }
  0xc9   :  { %v312_v41 = vstv %s1680_s15  ;;  %s1366_s9 = sld [smem:[#allocation2 + $0x41]]  ;;  %v464_v29 = vmul.f32 %v1096_v8, %v463_v17  ;;  %v452_v10 = vstv %s1327_s21  ;;  %v430_v17 = vmul.f32 %v429_v63, %v429_v63 }
  0xca   :  { %s1371_s28 = sld [smem:[#allocation5 + $0x15]]  ;;  %v313_v14 = vmul.f32 %v312_v41, %v310_v53  ;;  %v350_v19 = vmul.f32 %v349_v62, %v349_v62  ;;  %v461_v27 = vadd.f32 %v460_v13, %v457_v11  ;;  %v447_v41 = vstv %s1321_s29 }
  0xcb   :  { %s1375_s19 = sld [smem:[#allocation7 + $0x15]]  ;;  %v467_v46 = vstv %s1345_s20  ;;  %v410_v53 = vmul.f32 %v409_v45, %v409_v45  ;;  %v448_v54 = vadd.f32 %v447_v41, %v445_v61  ;;  %v373_v62 = vmul.f32 %v372_v50, %v370_v26 }
  0xcc   :  { %v332_v49 = vstv %s1681_s6  ;;  %s1381_s25 = sld [smem:[#allocation2 + $0x42]]  ;;  %v1418_v35 = vadd.f32 %v313_v14, %v1323_v12  ;;  %v465_v42 = vadd.f32 %v464_v29, %v461_v27  ;;  %v472_v21 = vstv %s1353_s0 }
  0xcd   :  { %s1384_s13 = sld [smem:[#allocation2 + $0x43]]  ;;  %v476_v30 = vstv %s1358_s12  ;;  %v333_v36 = vmul.f32 %v332_v49, %v330_v18  ;;  %v413_v7 = vmul.f32 %v412_v57, %v410_v53  ;;  %v449_v9 = vmax.f32 %v448_v54, 0.0 }
  0xce   :  { %s1682_s2 = sld [smem:[#allocation14_spill]]  ;;  %v479_v31 = vstv %s1361_s14  ;;  %v477_v37 = vmul.f32 %v476_v30, %v1072_v0  ;;  %v468_v58 = vadd.f32 %v467_v46, %v465_v42  ;;  %v374_v61 = vadd.f32 %v373_v62, %v1415_v34 }
  0xcf   :  { %s1389_s11 = sld [smem:[#allocation2 + $0x44]]  ;;  %v480_v12 = vmul.f32 %v1077_v1, %v479_v31  ;;  %v483_v43 = vstv %s1366_s9  ;;  %v334_v49 = vadd.f32 %v333_v36, %v1348_v28  ;;  %v450_v25 = vmul.f32 %v449_v9, %v449_v9 }
  0xd0   :  { %s1395_s16 = sld [smem:[#allocation5 + $0x16]]  ;;  %v484_v56 = vmul.f32 %v1096_v8, %v483_v43  ;;  %v469_v13 = vmax.f32 %v468_v58, 0.0  ;;  %v487_v14 = vstv %s1371_s28  ;;  %v433_v41 = vmul.f32 %v432_v4, %v430_v17 }
  0xd1   :  { %s1399_s30 = sld [smem:[#allocation7 + $0x16]]  ;;  %v481_v55 = vadd.f32 %v480_v12, %v477_v37  ;;  %v394_v37 = vadd.f32 %v393_v3, %v1418_v35  ;;  %v1493_v12 = vadd.f32 %v413_v7, %v334_v49  ;;  %v453_v46 = vmul.f32 %v452_v10, %v450_v25 }
  0xd2   :  { %s1402_s24 = sld [smem:[#allocation2 + $0x45]]  ;;  %v496_v47 = vstv %s1381_s25  ;;  %v470_v31 = vmul.f32 %v469_v13, %v469_v13  ;;  %v492_v58 = vstv %s1375_s19 }
  0xd3   :  { %s1405_s8 = sld [smem:[#allocation2 + $0x46]]  ;;  %v499_v48 = vstv %s1384_s13  ;;  %v497_v28 = vmul.f32 %v496_v47, %v1072_v0  ;;  %v485_v11 = vadd.f32 %v484_v56, %v481_v55  ;;  %v1527_v3 = vadd.f32 %v453_v46, %v374_v61 }
  0xd4   :  { %v352_v20 = vstv %s1682_s2  ;;  %s1410_s23 = sld [smem:[#allocation2 + $0x47]]  ;;  %v500_v59 = vmul.f32 %v1077_v1, %v499_v48  ;;  %v473_v47 = vmul.f32 %v472_v21, %v470_v31 }
  0xd5   :  { %s1420_s1 = sld [smem:[#allocation5 + $0x17]]  ;;  %v353_v38 = vmul.f32 %v352_v20, %v350_v19  ;;  %v503_v2 = vstv %s1389_s11  ;;  %v488_v27 = vadd.f32 %v487_v14, %v485_v11 }
  0xd6   :  { %s1423_s18 = sld [smem:[#allocation2 + $0x48]]  ;;  %v501_v15 = vadd.f32 %v500_v59, %v497_v28  ;;  %v504_v16 = vmul.f32 %v1096_v8, %v503_v2  ;;  %v507_v26 = vstv %s1395_s16 }
  0xd7   :  { %s1427_s27 = sld [smem:[#allocation2 + $0x49]]  ;;  %v1451_v60 = vadd.f32 %v353_v38, %v274_v33  ;;  %v489_v42 = vmax.f32 %v488_v27, 0.0  ;;  %v512_v4 = vstv %s1399_s30 }
  0xd8   :  { %s1431_s17 = sld [smem:[#allocation7 + $0x17]]  ;;  %v505_v33 = vadd.f32 %v504_v16, %v501_v15  ;;  %v516_v32 = vstv %s1402_s24 }
  0xd9   :  { %s1436_s5 = sld [smem:[#allocation2 + $0x4a]]  ;;  %v519_v36 = vstv %s1405_s8  ;;  %v517_v34 = vmul.f32 %v516_v32, %v1072_v0  ;;  %v1516_v56 = vadd.f32 %v433_v41, %v1451_v60  ;;  %v490_v57 = vmul.f32 %v489_v42, %v489_v42 }
  0xda   :  { %s1441_s10 = sld [smem:[#allocation5 + $0x18]]  ;;  %v520_v35 = vmul.f32 %v1077_v1, %v519_v36  ;;  %v508_v48 = vadd.f32 %v507_v26, %v505_v33  ;;  %v523_v49 = vstv %s1410_s23 }
  0xdb   :  { %s1444_s29 = sld [smem:[#allocation2 + $0x4b]]  ;;  %v524_v62 = vmul.f32 %v1096_v8, %v523_v49  ;;  %v493_v11 = vmul.f32 %v492_v58, %v490_v57  ;;  %v527_v13 = vstv %s1420_s1 }
  0xdc   :  { %s1449_s3 = sld [smem:[#allocation2 + $0x4c]]  ;;  %v536_v5 = vstv %s1423_s18  ;;  %v521_v59 = vadd.f32 %v520_v35, %v517_v34  ;;  %v509_v7 = vmax.f32 %v508_v48, 0.0 }
  0xdd   :  { %s1454_s7 = sld [smem:[#allocation2 + $0x4d]]  ;;  %v539_v6 = vstv %s1427_s27  ;;  %v537_v18 = vmul.f32 %v536_v5, %v1072_v0 }
  0xde   :  { %s1459_s26 = sld [smem:[#allocation7 + $0x18]]  ;;  %v540_v19 = vmul.f32 %v1077_v1, %v539_v6  ;;  %v1532_v6 = vadd.f32 %v473_v47, %v394_v37  ;;  %v525_v16 = vadd.f32 %v524_v62, %v521_v59  ;;  %v532_v17 = vstv %s1431_s17  ;;  %s946_s17 = smov [#allocation8]  }
  0xdf   :  { %s1462_s4 = sld [smem:[#allocation5 + $0x19]]  ;;  %v543_v22 = vstv %s1436_s5 }
  0xe0   :  { %s1466_s22 = sld [smem:[#allocation2 + $0x4e]]  ;;  %v541_v38 = vadd.f32 %v540_v19, %v537_v18  ;;  %v544_v39 = vmul.f32 %v1096_v8, %v543_v22  ;;  %v547_v52 = vstv %s1441_s10 }
  0xe1   :  { %v556_v20 = vstv %s1444_s29  ;;  %s1471_s21 = sld [smem:[#allocation2 + $0x4f]] }
  0xe2   :  { %v557_v23 = vmul.f32 %v556_v20, %v1072_v0  ;;  %v559_v24 = vstv %s1449_s3  ;;  %s1477_s15 = sld [smem:[#allocation7 + $0x19]]  ;;  %v545_v50 = vadd.f32 %v544_v39, %v541_v38 }
  0xe3   :  { %v560_v29 = vmul.f32 %v1077_v1, %v559_v24  ;;  %v563_v30 = vstv %s1454_s7  ;;  %s1481_s20 = sld [smem:[#allocation2 + $0x50]]  ;;  %v510_v24 = vmul.f32 %v509_v7, %v509_v7 }
  0xe4   :  { %s1485_s0 = sld [smem:[#allocation5 + $0x1a]]  ;;  %v564_v45 = vmul.f32 %v1096_v8, %v563_v30  ;;  %v548_v60 = vadd.f32 %v547_v52, %v545_v50  ;;  %v552_v36 = vstv %s1459_s26 }
  0xe5   :  { %v561_v40 = vadd.f32 %v560_v29, %v557_v23  ;;  %s1489_s6 = sld [smem:[#allocation2 + $0x51]]  ;;  %v567_v53 = vstv %s1462_s4 }
  0xe6   :  { %s1496_s12 = sld [smem:[#allocation2 + $0x52]]  ;;  %v576_v43 = vstv %s1466_s22  ;;  %v549_v20 = vmax.f32 %v548_v60, 0.0 }
  0xe7   :  { %v579_v44 = vstv %s1471_s21  ;;  %s1500_s14 = sld [smem:[#allocation7 + $0x1a]]  ;;  %v565_v51 = vadd.f32 %v564_v45, %v561_v40  ;;  %v577_v54 = vmul.f32 %v576_v43, %v1072_v0 }
  0xe8   :  { %s1504_s9 = sld [smem:[#allocation2 + $0x53]]  ;;  %v580_v55 = vmul.f32 %v1077_v1, %v579_v44  ;;  %v572_v38 = vstv %s1477_s15  ;;  %v494_v44 = vadd.f32 %v493_v11, %v1493_v12  ;;  %v513_v12 = vmul.f32 %v512_v4, %v510_v24 }
  0xe9   :  { %s1507_s28 = sld [smem:[#allocation5 + $0x1b]]  ;;  %v583_v28 = vstv %s1481_s20  ;;  %v568_v5 = vadd.f32 %v567_v53, %v565_v51 }
  0xea   :  { %s1513_s25 = sld [smem:[#allocation2 + $0x54]]  ;;  %v581_v9 = vadd.f32 %v580_v55, %v577_v54  ;;  %v584_v10 = vmul.f32 %v1096_v8, %v583_v28  ;;  %v587_v30 = vstv %s1485_s0 }
  0xeb   :  { %s1520_s13 = sld [smem:[#allocation2 + $0x55]]  ;;  %v596_v63 = vstv %s1489_s6  ;;  %v569_v21 = vmax.f32 %v568_v5, 0.0 }
  0xec   :  { %v599_v2 = vstv %s1496_s12  ;;  %s1525_s2 = sld [smem:[#allocation2 + $0x56]]  ;;  %v597_v14 = vmul.f32 %v596_v63, %v1072_v0  ;;  %v585_v25 = vadd.f32 %v584_v10, %v581_v9 }
  0xed   :  { %s1530_s19 = sld [smem:[#allocation5 + $0x1c]]  ;;  %v600_v15 = vmul.f32 %v1077_v1, %v599_v2  ;;  %v570_v40 = vmul.f32 %v569_v21, %v569_v21  ;;  %v592_v4 = vstv %s1500_s14 }
  0xee   :  { %s1535_s11 = sld [smem:[#allocation7 + $0x1b]]  ;;  %v603_v18 = vstv %s1504_s9  ;;  %v588_v37 = vadd.f32 %v587_v30, %v585_v25  ;;  %s705_s9 = sshll.u32 %s946_s17, 4  ;;  %s706_s9 = int_to_ptr.vmem [resolvable:$true] %s705_s9 }
  0xef   :  { %s1540_s16 = sld [smem:[#allocation2 + $0x57]]  ;;  %v601_v31 = vadd.f32 %v600_v15, %v597_v14  ;;  %v604_v33 = vmul.f32 %v1096_v8, %v603_v18  ;;  %v607_v49 = vstv %s1507_s28  ;;  %v573_v53 = vmul.f32 %v572_v38, %v570_v40  ;;  %s917_s28 = scalar_lea.vmem %s706_s9, 32 }
  0xf0   :  { %v616_v19 = vstv %s1513_s25  ;;  %s1545_s30 = sld [smem:[#allocation2 + $0x58]]  ;;  %v589_v55 = vmax.f32 %v588_v37, 0.0  ;;  %p918_p1 = scmp.ne.s32.totalorder %s706_s9, %s917_s28 }
  0xf1   :  { %v617_v22 = vmul.f32 %v616_v19, %v1072_v0  ;;  %v619_v23 = vstv %s1520_s13  ;;  %s1549_s24 = sld [smem:[#allocation2 + $0x59]]  ;;  %v528_v0 = vadd.f32 %v527_v13, %v525_v16  ;;  %v605_v46 = vadd.f32 %v604_v33, %v601_v31  ;;  %p922_p2 = scmp.lt.s32.totalorder %s706_s9, %s706_s9 }
  0xf2   :  { %v620_v27 = vmul.f32 %v1077_v1, %v619_v23  ;;  %v623_v29 = vstv %s1525_s2  ;;  %s1553_s8 = sld [smem:[#allocation5 + $0x1d]]  ;;  %v550_v1 = vmul.f32 %v549_v20, %v549_v20  ;;  %v574_v14 = vadd.f32 %v573_v53, %v494_v44  ;;  %p923_p3 = scmp.lt.s32.totalorder %s917_s28, %s917_s28 }
  0xf3   :  { %v624_v32 = vmul.f32 %v1096_v8, %v623_v29  ;;  %s1558_s23 = sld [smem:[#allocation7 + $0x1c]]  ;;  %v627_v45 = vstv %s1530_s19  ;;  %v529_v48 = vmax.f32 %v528_v0, 0.0  ;;  %v608_v59 = vadd.f32 %v607_v49, %v605_v46 }
  0xf4   :  { %v621_v39 = vadd.f32 %v620_v27, %v617_v22  ;;  %s1562_s1 = sld [smem:[#allocation2 + $0x5a]]  ;;  %v553_v52 = vmul.f32 %v552_v36, %v550_v1  ;;  %v590_v15 = vmul.f32 %v589_v55, %v589_v55  ;;  %v514_v33 = vadd.f32 %v513_v12, %v1516_v56  ;;  %p924_p4 = por %p923_p3, %p922_p2 }
  0xf5   :  { %v636_v61 = vstv %s1540_s16  ;;  %s1566_s18 = sld [smem:[#allocation2 + $0x5b]]  ;;  %v530_v2 = vmul.f32 %v529_v48, %v529_v48  ;;  %v609_v19 = vmax.f32 %v608_v59, 0.0 }
  0xf6   :  { %v625_v26 = vadd.f32 %v624_v32, %v621_v39  ;;  %s1683_s10 = sld [smem:[#allocation34_spill]]  ;;  %v639_v43 = vstv %s1545_s30  ;;  %v554_v7 = vadd.f32 %v553_v52, %v1532_v6  ;;  %v593_v32 = vmul.f32 %v592_v4, %v590_v15  ;;  %p925_p5 = pnand %p924_p4, %p918_p1 }
  0xf7   :  { %s1572_s29 = sld [smem:[#allocation2 + $0x5c]]  ;;  %v643_v35 = vstv %s1549_s24  ;;  %v533_v38 = vmul.f32 %v532_v17, %v530_v2  ;;  %v610_v39 = vmul.f32 %v609_v19, %v609_v19 }
  0xf8   :  { %s1579_s26 = sld [smem:[#allocation5 + $0x1e]]  ;;  %v628_v50 = vadd.f32 %v627_v45, %v625_v26  ;;  %v644_v51 = vmul.f32 %v1096_v8, %v643_v35  ;;  %v647_v58 = vstv %s1553_s8  ;;  %v612_v45 = vstv %s1535_s11 }
  0xf9   :  { %s1583_s4 = sld [smem:[#allocation7 + $0x1d]]  ;;  %v632_v16 = vstv %s1558_s23  ;;  %v594_v44 = vadd.f32 %v593_v32, %v514_v33  ;;  %v534_v56 = vadd.f32 %v533_v38, %v1527_v3 }
  0xfa   :  { %s1585_s22 = sld [smem:[#allocation2 + $0x5d]]  ;;  %v629_v57 = vmax.f32 %v628_v50, 0.0  ;;  %v656_v28 = vstv %s1562_s1 }
  0xfb   :  { %s1589_s21 = sld [smem:[#allocation2 + $0x5e]]  ;;  %v659_v8 = vstv %s1566_s18 }
  0xfc   :  { %v878_v41 = vld [vmem:[%s1683_s10] sm:$0x3]  ;;  %v879_v47 = vld [vmem:[%s1683_s10 + $0x2] sm:$0x3]  ;;  %s1592_s15 = sld [smem:[#allocation2 + $0x5f]]  ;;  %v630_v9 = vmul.f32 %v629_v57, %v629_v57 }
  0xfd   :  { %v637_v42 = vmul.f32 %v878_v41, %v636_v61  ;;  %v640_v34 = vmul.f32 %v879_v47, %v639_v43  ;;  %v657_v63 = vmul.f32 %v878_v41, %v656_v28  ;;  %v660_v60 = vmul.f32 %v879_v47, %v659_v8  ;;  %s1596_s20 = sld [smem:[#allocation5 + $0x1f]]  ;;  %v880_v11 = vld [vmem:[%s1683_s10 + $0x4] sm:$0x3] }
  0xfe   :  { %v663_v5 = vstv %s1572_s29  ;;  %s1602_s12 = sld [smem:[#allocation7 + $0x1e]]  ;;  %v667_v21 = vstv %s1579_s26  ;;  %v633_v27 = vmul.f32 %v632_v16, %v630_v9 }
  0xff   :  { %v641_v54 = vadd.f32 %v640_v34, %v637_v42  ;;  %v664_v13 = vmul.f32 %v880_v11, %v663_v5  ;;  %v661_v18 = vadd.f32 %v660_v60, %v657_v63  ;;  %v652_v22 = vstv %s1583_s4  ;;  %s873_s14 = sld [smem:[#allocation7 + $0x1f]] }
 0x100   :  { %v676_v6 = vstv %s1585_s22  ;;  %v634_v26 = vadd.f32 %v633_v27, %v554_v7 }
 0x101   :  { %v645_v62 = vadd.f32 %v644_v51, %v641_v54  ;;  %v665_v23 = vadd.f32 %v664_v13, %v661_v18  ;;  %v677_v24 = vmul.f32 %v878_v41, %v676_v6  ;;  %v679_v25 = vstv %s1589_s21 }
 0x102   :  { %v680_v30 = vmul.f32 %v879_v47, %v679_v25  ;;  %v683_v31 = vstv %s1592_s15  ;;  %v613_v47 = vmul.f32 %v612_v45, %v610_v39 }
 0x103   :  { %v648_v10 = vadd.f32 %v647_v58, %v645_v62  ;;  %v668_v0 = vadd.f32 %v667_v21, %v665_v23  ;;  %v684_v36 = vmul.f32 %v880_v11, %v683_v31  ;;  %v687_v37 = vstv %s1596_s20 }
 0x104   :  { %v681_v40 = vadd.f32 %v680_v30, %v677_v24  ;;  %v672_v42 = vstv %s1602_s12  ;;  %v614_v51 = vadd.f32 %v613_v47, %v534_v56 }
 0x105   :  { %v649_v20 = vmax.f32 %v648_v10, 0.0  ;;  %v669_v61 = vmax.f32 %v668_v0, 0.0  ;;  %v692_v50 = vstv %s873_s14 }
 0x106   :  { %v685_v43 = vadd.f32 %v684_v36, %v681_v40 }
 0x107   :  { %v650_v29 = vmul.f32 %v649_v20, %v649_v20  ;;  %v670_v46 = vmul.f32 %v669_v61, %v669_v61 }
 0x108   :  { %v688_v34 = vadd.f32 %v687_v37, %v685_v43 }
 0x109   :  { %v653_v1 = vmul.f32 %v652_v22, %v650_v29  ;;  %v673_v35 = vmul.f32 %v672_v42, %v670_v46 }
 0x10a   :  { %v689_v48 = vmax.f32 %v688_v34, 0.0 }
 0x10b   :  { %v654_v41 = vadd.f32 %v653_v1, %v574_v14  ;;  %v674_v17 = vadd.f32 %v673_v35, %v594_v44 }
 0x10c   :  { %v690_v12 = vmul.f32 %v689_v48, %v689_v48 }
 0x10d   :  { %v695_v49 = vadd.f32 %v654_v41, %v634_v26 }
 0x10e   :  { %v693_v52 = vmul.f32 %v692_v50, %v690_v12 }
 0x10f   :  { %v696_v53 = vadd.f32 %v695_v49, %v674_v17 }
 0x110   :  { %v694_v54 = vadd.f32 %v693_v52, %v614_v51 }
 0x112   :  { %v697_v55 = vadd.f32 %v696_v53, %v694_v54 }
 0x114   :  { %698 = vst [vmem:[#allocation8] sm:$0x3] %v697_v55 }
 0x115   :  { %928 = shalt.err (!%p925_p5)
}
 0x116   :  { %s1684_s2 = sld [smem:[#allocation35_spill]] }
 0x11c   :  { %708 = dma.vmem_to_hbm [thread:$0]  %s706_s9, 32, %s1684_s2, [#allocation3]  }
 0x11d   :  { %941 = dma.done.wait [#allocation3], 32  }
 0x11e   :  { %942 = vsyncadd [#allocation3], 4294967264 }
 0x11f   :  { %712 = vsyncpa [#allocation3], 1 }
 0x120   :  { %713 = vsyncpa [#allocation4], 1 }
 0x121   :  { %714 = vsyncpa [#allocation6], 1 }

</bundles_post_ra>
